<compile_context>
chip_gen: v7x
topology: tpu7x:2x2x1
jax: 0.10.0
libtpu: 0.0.40
codegen_flags: <defaults>
</compile_context>

<pallas_src>
import functools

import jax
import jax.numpy as jnp
import numpy as np
from jax.experimental import pallas as pl
from jax.experimental.pallas import tpu as pltpu


def _layernorm(h, gamma, beta, eps):
    mu = jnp.mean(h, axis=-1, keepdims=True)
    xc = h - mu
    var = jnp.mean(xc * xc, axis=-1, keepdims=True)
    return xc * jax.lax.rsqrt(var + eps) * gamma + beta


def mha_block_kernel(x_ref, mask_ref,
                     wq_ref, wk_ref, wv_ref, wo_ref,
                     g1_ref, b1_ref,
                     w1_ref, bb1_ref, w2_ref, bb2_ref,
                     g2_ref, b2_ref,
                     o_ref, *, eps):
    bt, S, D = x_ref.shape
    H = wq_ref.shape[0]

    mask = mask_ref[...][None].astype(jnp.float32)      # (1, S, S) additive mask
    wq = wq_ref[...]                                    # (H, D, hd), q-scale folded in
    wk = wk_ref[...]                                    # (H, D, hd)
    wv = wv_ref[...]                                    # (H, D, hd)
    wo = wo_ref[...]                                    # (H, hd, D)

    # ---- multi-head self-attention, heads batched in one contraction -------
    attn_rows = []
    for b in range(bt):                                 # static, small (Bt) loop
        xb = x_ref[b].astype(jnp.float32)               # (S, D)
        xh = jnp.broadcast_to(xb[None], (H, S, D))      # (H, S, D)
        q = jnp.einsum('hsd,hde->hse', xh, wq, preferred_element_type=jnp.float32)
        k = jnp.einsum('hsd,hde->hse', xh, wk, preferred_element_type=jnp.float32)
        v = jnp.einsum('hsd,hde->hse', xh, wv, preferred_element_type=jnp.float32)
        s = jnp.einsum('hqe,hke->hqk', q, k,
                       preferred_element_type=jnp.float32) + mask     # (H, S, S)
        s = s - jnp.max(s, axis=-1, keepdims=True)
        p = jnp.exp(s)
        p = p * pl.reciprocal(jnp.sum(p, axis=-1, keepdims=True))
        ctx = jnp.einsum('hqk,hke->hqe', p, v,
                         preferred_element_type=jnp.float32)          # (H, S, hd)
        # out-projection per head, then sum over heads == concat(heads) @ Wo^T
        attn_b = jnp.einsum('hse,hed->hsd', ctx, wo,
                            preferred_element_type=jnp.float32)       # (H, S, D)
        attn_rows.append(jnp.sum(attn_b, axis=0))                     # (S, D)

    attn = attn_rows[0] if bt == 1 else jnp.concatenate(attn_rows, axis=0)
    xf = x_ref[...].astype(jnp.float32).reshape(bt * S, D)            # flat rows

    # ---- residual + LayerNorm 1 (flat over Bt*S rows) -----------------------
    h1 = xf + attn
    l1 = _layernorm(h1, g1_ref[...], b1_ref[...], eps)

    # ---- FFN: Conv1d(k=1) == linear over d_model; weights pre-transposed ----
    f = jnp.dot(l1, w1_ref[...], preferred_element_type=jnp.float32) + bb1_ref[...]
    f = jnp.maximum(f, 0.0)
    f2 = jnp.dot(f, w2_ref[...], preferred_element_type=jnp.float32) + bb2_ref[...]

    # ---- residual + LayerNorm 2 ---------------------------------------------
    out = _layernorm(l1 + f2, g2_ref[...], b2_ref[...], eps)
    o_ref[...] = out.reshape(bt, S, D).astype(o_ref.dtype)


def mha_block_v2(x, att_mask, params, *, n_heads, eps=1e-6, max_rows_per_step=256):
    """x: (B, S, D) float32; att_mask: (S, S) additive float mask."""
    B, S, D = x.shape
    (wq, wk, wv, wo, g1, b1, w1, bb1, w2, bb2, g2, b2) = params
    d_ff = w1.shape[0]
    hd = D // n_heads
    scale = 1.0 / float(np.sqrt(hd))

    # Host-side weight prep: fold q-scale, pre-transpose, head-major layout.
    wq_hm = jnp.transpose((wq * scale).reshape(n_heads, hd, D), (0, 2, 1))  # (H, D, hd)
    wk_hm = jnp.transpose(wk.reshape(n_heads, hd, D), (0, 2, 1))            # (H, D, hd)
    wv_hm = jnp.transpose(wv.reshape(n_heads, hd, D), (0, 2, 1))            # (H, D, hd)
    wo_hm = wo.T.reshape(n_heads, hd, D)                                    # (H, hd, D)
    w1t = w1.T                                                              # (D, d_ff)
    w2t = w2.T                                                              # (d_ff, D)

    # Batch-tiling: largest divisor of B keeping Bt*S <= max_rows_per_step.
    bt = 1
    row_budget = max(S, max_rows_per_step)
    for cand in range(1, B + 1):
        if B % cand == 0 and cand * S <= row_budget:
            bt = cand
    grid = (B // bt,)

    def const_spec(shape):
        nd = len(shape)
        return pl.BlockSpec(shape, lambda i, _nd=nd: (0,) * _nd)

    kernel = functools.partial(mha_block_kernel, eps=eps)

    return pl.pallas_call(
        kernel,
        out_shape=jax.ShapeDtypeStruct((B, S, D), jnp.float32),
        grid=grid,
        in_specs=[
            pl.BlockSpec((bt, S, D), lambda i: (i, 0, 0)),   # x
            const_spec((S, S)),                              # att_mask
            const_spec((n_heads, D, hd)),                    # Wq (head-major, scaled)
            const_spec((n_heads, D, hd)),                    # Wk
            const_spec((n_heads, D, hd)),                    # Wv
            const_spec((n_heads, hd, D)),                    # Wo
            const_spec((1, D)),                              # norm1 gamma
            const_spec((1, D)),                              # norm1 beta
            const_spec((D, d_ff)),                           # fc_1 weight^T
            const_spec((1, d_ff)),                           # fc_1 bias
            const_spec((d_ff, D)),                           # fc_2 weight^T
            const_spec((1, D)),                              # fc_2 bias
            const_spec((1, D)),                              # norm2 gamma
            const_spec((1, D)),                              # norm2 beta
        ],
        out_specs=pl.BlockSpec((bt, S, D), lambda i: (i, 0, 0)),
        compiler_params=pltpu.CompilerParams(
            dimension_semantics=("parallel",)),
    )(x, att_mask, wq_hm, wk_hm, wv_hm, wo_hm,
      g1, b1, w1t, bb1, w2t, bb2, g2, b2)


def reference(x, att_mask, params, n_heads, eps=1e-6):
    """Pure-JAX reference mirroring the PyTorch forward."""
    (wq, wk, wv, wo, g1, b1, w1, bb1, w2, bb2, g2, b2) = params
    B, S, D = x.shape
    hd = D // n_heads
    q = (x @ wq.T).reshape(B, S, n_heads, hd) * (1.0 / np.sqrt(hd))
    k = (x @ wk.T).reshape(B, S, n_heads, hd)
    v = (x @ wv.T).reshape(B, S, n_heads, hd)
    s = jnp.einsum("bqhd,bkhd->bhqk", q, k) + att_mask[None, None]
    p = jax.nn.softmax(s, axis=-1)
    ctx = jnp.einsum("bhqk,bkhd->bqhd", p, v).reshape(B, S, D)
    attn = ctx @ wo.T

    def ln(h, g, bta):
        mu = jnp.mean(h, axis=-1, keepdims=True)
        var = jnp.mean((h - mu) ** 2, axis=-1, keepdims=True)
        return (h - mu) / jnp.sqrt(var + eps) * g + bta

    h1 = x + attn
    l1 = ln(h1, g1, b1)
    f = jnp.maximum(l1 @ w1.T + bb1, 0.0)
    f2 = f @ w2.T + bb2
    return ln(l1 + f2, g2, b2)


if __name__ == "__main__":
    B, S, d_model, d_ff, n_heads = 2, 8, 32, 64, 4

    key = jax.random.PRNGKey(0)
    keys = jax.random.split(key, 16)

    x = jax.random.normal(keys[0], (B, S, d_model), dtype=jnp.float32)
    att_mask = 0.1 * jax.random.normal(keys[1], (S, S), dtype=jnp.float32)

    def init(k, shape, scale=0.1):
        return scale * jax.random.normal(k, shape, dtype=jnp.float32)

    wq = init(keys[2], (d_model, d_model))
    wk = init(keys[3], (d_model, d_model))
    wv = init(keys[4], (d_model, d_model))
    wo = init(keys[5], (d_model, d_model))
    g1 = 1.0 + init(keys[6], (1, d_model), 0.05)
    b1 = init(keys[7], (1, d_model), 0.05)
    w1 = init(keys[8], (d_ff, d_model))          # Conv1d(d_model, d_ff, 1).weight squeezed
    bb1 = init(keys[9], (1, d_ff), 0.05)
    w2 = init(keys[10], (d_model, d_ff))         # Conv1d(d_ff, d_model, 1).weight squeezed
    bb2 = init(keys[11], (1, d_model), 0.05)
    g2 = 1.0 + init(keys[12], (1, d_model), 0.05)
    b2 = init(keys[13], (1, d_model), 0.05)

    params = (wq, wk, wv, wo, g1, b1, w1, bb1, w2, bb2, g2, b2)

    out = mha_block_v2(x, att_mask, params, n_heads=n_heads)
    out = jax.block_until_ready(out)

    ref = jax.block_until_ready(reference(x, att_mask, params, n_heads))
    np.testing.assert_allclose(np.asarray(out), np.asarray(ref), rtol=1e-4, atol=1e-4)

    print("KERNEL_OK")
</pallas_src>

<mosaic_0001>
module attributes {stable_mosaic.version = 11 : i64} {
  func.func @mha_block_kernel(%arg0: i32, %arg1: memref<2x8x32xf32, #tpu.memory_space<vmem>>, %arg2: memref<8x8xf32, #tpu.memory_space<vmem>>, %arg3: memref<4x32x8xf32, #tpu.memory_space<vmem>>, %arg4: memref<4x32x8xf32, #tpu.memory_space<vmem>>, %arg5: memref<4x32x8xf32, #tpu.memory_space<vmem>>, %arg6: memref<4x8x32xf32, #tpu.memory_space<vmem>>, %arg7: memref<1x32xf32, #tpu.memory_space<vmem>>, %arg8: memref<1x32xf32, #tpu.memory_space<vmem>>, %arg9: memref<32x64xf32, #tpu.memory_space<vmem>>, %arg10: memref<1x64xf32, #tpu.memory_space<vmem>>, %arg11: memref<64x32xf32, #tpu.memory_space<vmem>>, %arg12: memref<1x32xf32, #tpu.memory_space<vmem>>, %arg13: memref<1x32xf32, #tpu.memory_space<vmem>>, %arg14: memref<1x32xf32, #tpu.memory_space<vmem>>, %arg15: memref<2x8x32xf32, #tpu.memory_space<vmem>>) attributes {dimension_semantics = [#tpu.dimension_semantics<parallel>], iteration_bounds = array<i64: 1>, scalar_prefetch = 0 : i64, scratch_operands = 0 : i64, tpu.core_type = #tpu.core_type<tc>, window_params = [{transform_indices = @transform_0, window_bounds = array<i64: 2, 8, 32>}, {pipeline_mode = #tpu.pipeline_mode<synchronous>, transform_indices = @transform_1, window_bounds = array<i64: 8, 8>}, {pipeline_mode = #tpu.pipeline_mode<synchronous>, transform_indices = @transform_2, window_bounds = array<i64: 4, 32, 8>}, {pipeline_mode = #tpu.pipeline_mode<synchronous>, transform_indices = @transform_3, window_bounds = array<i64: 4, 32, 8>}, {pipeline_mode = #tpu.pipeline_mode<synchronous>, transform_indices = @transform_4, window_bounds = array<i64: 4, 32, 8>}, {pipeline_mode = #tpu.pipeline_mode<synchronous>, transform_indices = @transform_5, window_bounds = array<i64: 4, 8, 32>}, {pipeline_mode = #tpu.pipeline_mode<synchronous>, transform_indices = @transform_6, window_bounds = array<i64: 1, 32>}, {pipeline_mode = #tpu.pipeline_mode<synchronous>, transform_indices = @transform_7, window_bounds = array<i64: 1, 32>}, {pipeline_mode = #tpu.pipeline_mode<synchronous>, transform_indices = @transform_8, window_bounds = array<i64: 32, 64>}, {pipeline_mode = #tpu.pipeline_mode<synchronous>, transform_indices = @transform_9, window_bounds = array<i64: 1, 64>}, {pipeline_mode = #tpu.pipeline_mode<synchronous>, transform_indices = @transform_10, window_bounds = array<i64: 64, 32>}, {pipeline_mode = #tpu.pipeline_mode<synchronous>, transform_indices = @transform_11, window_bounds = array<i64: 1, 32>}, {pipeline_mode = #tpu.pipeline_mode<synchronous>, transform_indices = @transform_12, window_bounds = array<i64: 1, 32>}, {pipeline_mode = #tpu.pipeline_mode<synchronous>, transform_indices = @transform_13, window_bounds = array<i64: 1, 32>}, {transform_indices = @transform_14, window_bounds = array<i64: 2, 8, 32>}]} {
    %c0 = arith.constant 0 : index
    %c0_0 = arith.constant 0 : index
    %0 = vector.load %arg2[%c0, %c0_0] : memref<8x8xf32, #tpu.memory_space<vmem>>, vector<8x8xf32>
    %1 = vector.shape_cast %0 : vector<8x8xf32> to vector<1x8x8xf32>
    %c0_1 = arith.constant 0 : index
    %c0_2 = arith.constant 0 : index
    %c0_3 = arith.constant 0 : index
    %2 = vector.load %arg3[%c0_1, %c0_2, %c0_3] : memref<4x32x8xf32, #tpu.memory_space<vmem>>, vector<4x32x8xf32>
    %c0_4 = arith.constant 0 : index
    %c0_5 = arith.constant 0 : index
    %c0_6 = arith.constant 0 : index
    %3 = vector.load %arg4[%c0_4, %c0_5, %c0_6] : memref<4x32x8xf32, #tpu.memory_space<vmem>>, vector<4x32x8xf32>
    %c0_7 = arith.constant 0 : index
    %c0_8 = arith.constant 0 : index
    %c0_9 = arith.constant 0 : index
    %4 = vector.load %arg5[%c0_7, %c0_8, %c0_9] : memref<4x32x8xf32, #tpu.memory_space<vmem>>, vector<4x32x8xf32>
    %c0_10 = arith.constant 0 : index
    %c0_11 = arith.constant 0 : index
    %c0_12 = arith.constant 0 : index
    %5 = vector.load %arg6[%c0_10, %c0_11, %c0_12] : memref<4x8x32xf32, #tpu.memory_space<vmem>>, vector<4x8x32xf32>
    %c0_13 = arith.constant 0 : index
    %c0_14 = arith.constant 0 : index
    %c0_15 = arith.constant 0 : index
    %6 = vector.load %arg1[%c0_13, %c0_14, %c0_15] : memref<2x8x32xf32, #tpu.memory_space<vmem>>, vector<1x8x32xf32>
    %7 = vector.shape_cast %6 : vector<1x8x32xf32> to vector<8x32xf32>
    %8 = vector.shape_cast %7 : vector<8x32xf32> to vector<1x8x32xf32>
    %9 = vector.shape_cast %8 : vector<1x8x32xf32> to vector<1x8x32xf32>
    %10 = vector.broadcast %9 : vector<1x8x32xf32> to vector<4x8x32xf32>
    "tpu.trace_start"() <{level = 10 : i32, message = "hsd,hde->hse"}> : () -> ()
    %cst = arith.constant dense<0.000000e+00> : vector<4x8x8xf32>
    %11 = tpu.matmul %10, %2, %cst {dimension_numbers = #tpu.dot_dimension_numbers<[2], [1], [1], [2], [0, 0, 0, 1, 1, 2], [0], [0]>} : vector<4x8x32xf32>, vector<4x32x8xf32>, vector<4x8x8xf32> -> vector<4x8x8xf32>
    %cst_16 = arith.constant dense<0.000000e+00> : vector<4x8x8xf32>
    %12 = tpu.matmul %10, %3, %cst_16 {dimension_numbers = #tpu.dot_dimension_numbers<[2], [1], [1], [2], [0, 0, 0, 1, 1, 2], [0], [0]>} : vector<4x8x32xf32>, vector<4x32x8xf32>, vector<4x8x8xf32> -> vector<4x8x8xf32>
    %cst_17 = arith.constant dense<0.000000e+00> : vector<4x8x8xf32>
    %13 = tpu.matmul %10, %4, %cst_17 {dimension_numbers = #tpu.dot_dimension_numbers<[2], [1], [1], [2], [0, 0, 0, 1, 1, 2], [0], [0]>} : vector<4x8x32xf32>, vector<4x32x8xf32>, vector<4x8x8xf32> -> vector<4x8x8xf32>
    "tpu.trace_stop"() : () -> ()
    "tpu.trace_start"() <{level = 10 : i32, message = "hqe,hke->hqk"}> : () -> ()
    %cst_18 = arith.constant dense<0.000000e+00> : vector<4x8x8xf32>
    %14 = tpu.matmul %11, %12, %cst_18 {dimension_numbers = #tpu.dot_dimension_numbers<[2], [2], [1], [1], [0, 0, 0, 1, 1, 1], [0], [0]>} : vector<4x8x8xf32>, vector<4x8x8xf32>, vector<4x8x8xf32> -> vector<4x8x8xf32>
    "tpu.trace_stop"() : () -> ()
    %15 = vector.broadcast %1 : vector<1x8x8xf32> to vector<4x8x8xf32>
    %16 = arith.addf %14, %15 : vector<4x8x8xf32>
    %cst_19 = arith.constant dense<0xFF800000> : vector<4x8xf32>
    %17 = vector.multi_reduction <maximumf>, %16, %cst_19 [2] : vector<4x8x8xf32> to vector<4x8xf32>
    %18 = vector.shape_cast %17 : vector<4x8xf32> to vector<4x8x1xf32>
    %19 = vector.broadcast %18 : vector<4x8x1xf32> to vector<4x8x8xf32>
    %20 = arith.subf %16, %19 : vector<4x8x8xf32>
    %21 = math.exp %20 : vector<4x8x8xf32>
    %cst_20 = arith.constant dense<0.000000e+00> : vector<4x8xf32>
    %22 = vector.multi_reduction <add>, %21, %cst_20 [2] : vector<4x8x8xf32> to vector<4x8xf32>
    %23 = vector.shape_cast %22 : vector<4x8xf32> to vector<4x8x1xf32>
    %24 = tpu.reciprocal %23 : vector<4x8x1xf32> -> vector<4x8x1xf32>
    %25 = vector.broadcast %24 : vector<4x8x1xf32> to vector<4x8x8xf32>
    %26 = arith.mulf %21, %25 : vector<4x8x8xf32>
    "tpu.trace_start"() <{level = 10 : i32, message = "hqk,hke->hqe"}> : () -> ()
    %cst_21 = arith.constant dense<0.000000e+00> : vector<4x8x8xf32>
    %27 = tpu.matmul %26, %13, %cst_21 {dimension_numbers = #tpu.dot_dimension_numbers<[2], [1], [1], [2], [0, 0, 0, 1, 1, 2], [0], [0]>} : vector<4x8x8xf32>, vector<4x8x8xf32>, vector<4x8x8xf32> -> vector<4x8x8xf32>
    "tpu.trace_stop"() : () -> ()
    "tpu.trace_start"() <{level = 10 : i32, message = "hse,hed->hsd"}> : () -> ()
    %cst_22 = arith.constant dense<0.000000e+00> : vector<4x8x32xf32>
    %28 = tpu.matmul %27, %5, %cst_22 {dimension_numbers = #tpu.dot_dimension_numbers<[2], [1], [1], [2], [0, 0, 0, 1, 1, 2], [0], [0]>} : vector<4x8x8xf32>, vector<4x8x32xf32>, vector<4x8x32xf32> -> vector<4x8x32xf32>
    "tpu.trace_stop"() : () -> ()
    %cst_23 = arith.constant dense<0.000000e+00> : vector<8x32xf32>
    %29 = vector.multi_reduction <add>, %28, %cst_23 [0] : vector<4x8x32xf32> to vector<8x32xf32>
    %c1 = arith.constant 1 : index
    %c0_24 = arith.constant 0 : index
    %c0_25 = arith.constant 0 : index
    %30 = vector.load %arg1[%c1, %c0_24, %c0_25] : memref<2x8x32xf32, #tpu.memory_space<vmem>>, vector<1x8x32xf32>
    %31 = vector.shape_cast %30 : vector<1x8x32xf32> to vector<8x32xf32>
    %32 = vector.shape_cast %31 : vector<8x32xf32> to vector<1x8x32xf32>
    %33 = vector.shape_cast %32 : vector<1x8x32xf32> to vector<1x8x32xf32>
    %34 = vector.broadcast %33 : vector<1x8x32xf32> to vector<4x8x32xf32>
    "tpu.trace_start"() <{level = 10 : i32, message = "hsd,hde->hse"}> : () -> ()
    %cst_26 = arith.constant dense<0.000000e+00> : vector<4x8x8xf32>
    %35 = tpu.matmul %34, %2, %cst_26 {dimension_numbers = #tpu.dot_dimension_numbers<[2], [1], [1], [2], [0, 0, 0, 1, 1, 2], [0], [0]>} : vector<4x8x32xf32>, vector<4x32x8xf32>, vector<4x8x8xf32> -> vector<4x8x8xf32>
    %cst_27 = arith.constant dense<0.000000e+00> : vector<4x8x8xf32>
    %36 = tpu.matmul %34, %3, %cst_27 {dimension_numbers = #tpu.dot_dimension_numbers<[2], [1], [1], [2], [0, 0, 0, 1, 1, 2], [0], [0]>} : vector<4x8x32xf32>, vector<4x32x8xf32>, vector<4x8x8xf32> -> vector<4x8x8xf32>
    %cst_28 = arith.constant dense<0.000000e+00> : vector<4x8x8xf32>
    %37 = tpu.matmul %34, %4, %cst_28 {dimension_numbers = #tpu.dot_dimension_numbers<[2], [1], [1], [2], [0, 0, 0, 1, 1, 2], [0], [0]>} : vector<4x8x32xf32>, vector<4x32x8xf32>, vector<4x8x8xf32> -> vector<4x8x8xf32>
    "tpu.trace_stop"() : () -> ()
    "tpu.trace_start"() <{level = 10 : i32, message = "hqe,hke->hqk"}> : () -> ()
    %cst_29 = arith.constant dense<0.000000e+00> : vector<4x8x8xf32>
    %38 = tpu.matmul %35, %36, %cst_29 {dimension_numbers = #tpu.dot_dimension_numbers<[2], [2], [1], [1], [0, 0, 0, 1, 1, 1], [0], [0]>} : vector<4x8x8xf32>, vector<4x8x8xf32>, vector<4x8x8xf32> -> vector<4x8x8xf32>
    "tpu.trace_stop"() : () -> ()
    %39 = vector.broadcast %1 : vector<1x8x8xf32> to vector<4x8x8xf32>
    %40 = arith.addf %38, %39 : vector<4x8x8xf32>
    %cst_30 = arith.constant dense<0xFF800000> : vector<4x8xf32>
    %41 = vector.multi_reduction <maximumf>, %40, %cst_30 [2] : vector<4x8x8xf32> to vector<4x8xf32>
    %42 = vector.shape_cast %41 : vector<4x8xf32> to vector<4x8x1xf32>
    %43 = vector.broadcast %42 : vector<4x8x1xf32> to vector<4x8x8xf32>
    %44 = arith.subf %40, %43 : vector<4x8x8xf32>
    %45 = math.exp %44 : vector<4x8x8xf32>
    %cst_31 = arith.constant dense<0.000000e+00> : vector<4x8xf32>
    %46 = vector.multi_reduction <add>, %45, %cst_31 [2] : vector<4x8x8xf32> to vector<4x8xf32>
    %47 = vector.shape_cast %46 : vector<4x8xf32> to vector<4x8x1xf32>
    %48 = tpu.reciprocal %47 : vector<4x8x1xf32> -> vector<4x8x1xf32>
    %49 = vector.broadcast %48 : vector<4x8x1xf32> to vector<4x8x8xf32>
    %50 = arith.mulf %45, %49 : vector<4x8x8xf32>
    "tpu.trace_start"() <{level = 10 : i32, message = "hqk,hke->hqe"}> : () -> ()
    %cst_32 = arith.constant dense<0.000000e+00> : vector<4x8x8xf32>
    %51 = tpu.matmul %50, %37, %cst_32 {dimension_numbers = #tpu.dot_dimension_numbers<[2], [1], [1], [2], [0, 0, 0, 1, 1, 2], [0], [0]>} : vector<4x8x8xf32>, vector<4x8x8xf32>, vector<4x8x8xf32> -> vector<4x8x8xf32>
    "tpu.trace_stop"() : () -> ()
    "tpu.trace_start"() <{level = 10 : i32, message = "hse,hed->hsd"}> : () -> ()
    %cst_33 = arith.constant dense<0.000000e+00> : vector<4x8x32xf32>
    %52 = tpu.matmul %51, %5, %cst_33 {dimension_numbers = #tpu.dot_dimension_numbers<[2], [1], [1], [2], [0, 0, 0, 1, 1, 2], [0], [0]>} : vector<4x8x8xf32>, vector<4x8x32xf32>, vector<4x8x32xf32> -> vector<4x8x32xf32>
    "tpu.trace_stop"() : () -> ()
    %cst_34 = arith.constant dense<0.000000e+00> : vector<8x32xf32>
    %53 = vector.multi_reduction <add>, %52, %cst_34 [0] : vector<4x8x32xf32> to vector<8x32xf32>
    %54 = tpu.concatenate %29, %53 in 0 : vector<8x32xf32>, vector<8x32xf32> -> vector<16x32xf32>
    %c0_35 = arith.constant 0 : index
    %c0_36 = arith.constant 0 : index
    %c0_37 = arith.constant 0 : index
    %55 = vector.load %arg1[%c0_35, %c0_36, %c0_37] : memref<2x8x32xf32, #tpu.memory_space<vmem>>, vector<2x8x32xf32>
    %56 = vector.shape_cast %55 : vector<2x8x32xf32> to vector<16x32xf32>
    %57 = arith.addf %56, %54 : vector<16x32xf32>
    %c0_38 = arith.constant 0 : index
    %c0_39 = arith.constant 0 : index
    %58 = vector.load %arg7[%c0_38, %c0_39] : memref<1x32xf32, #tpu.memory_space<vmem>>, vector<1x32xf32>
    %c0_40 = arith.constant 0 : index
    %c0_41 = arith.constant 0 : index
    %59 = vector.load %arg8[%c0_40, %c0_41] : memref<1x32xf32, #tpu.memory_space<vmem>>, vector<1x32xf32>
    %cst_42 = arith.constant dense<0.000000e+00> : vector<16xf32>
    %60 = vector.multi_reduction <add>, %57, %cst_42 [1] : vector<16x32xf32> to vector<16xf32>
    %61 = vector.shape_cast %60 : vector<16xf32> to vector<16x1xf32>
    %cst_43 = arith.constant 3.200000e+01 : f32
    %62 = vector.broadcast %cst_43 : f32 to vector<16x1xf32>
    %63 = arith.divf %61, %62 : vector<16x1xf32>
    %64 = vector.broadcast %63 : vector<16x1xf32> to vector<16x32xf32>
    %65 = arith.subf %57, %64 : vector<16x32xf32>
    %66 = arith.mulf %65, %65 : vector<16x32xf32>
    %cst_44 = arith.constant dense<0.000000e+00> : vector<16xf32>
    %67 = vector.multi_reduction <add>, %66, %cst_44 [1] : vector<16x32xf32> to vector<16xf32>
    %68 = vector.shape_cast %67 : vector<16xf32> to vector<16x1xf32>
    %cst_45 = arith.constant 3.200000e+01 : f32
    %69 = vector.broadcast %cst_45 : f32 to vector<16x1xf32>
    %70 = arith.divf %68, %69 : vector<16x1xf32>
    %cst_46 = arith.constant 9.99999997E-7 : f32
    %71 = vector.broadcast %cst_46 : f32 to vector<16x1xf32>
    %72 = arith.addf %70, %71 : vector<16x1xf32>
    %73 = math.rsqrt %72 : vector<16x1xf32>
    %74 = vector.broadcast %73 : vector<16x1xf32> to vector<16x32xf32>
    %75 = arith.mulf %65, %74 : vector<16x32xf32>
    %76 = vector.broadcast %58 : vector<1x32xf32> to vector<16x32xf32>
    %77 = arith.mulf %75, %76 : vector<16x32xf32>
    %78 = vector.broadcast %59 : vector<1x32xf32> to vector<16x32xf32>
    %79 = arith.addf %77, %78 : vector<16x32xf32>
    %c0_47 = arith.constant 0 : index
    %c0_48 = arith.constant 0 : index
    %80 = vector.load %arg9[%c0_47, %c0_48] : memref<32x64xf32, #tpu.memory_space<vmem>>, vector<32x64xf32>
    %cst_49 = arith.constant dense<0.000000e+00> : vector<16x64xf32>
    %81 = tpu.matmul %79, %80, %cst_49 {dimension_numbers = #tpu.dot_dimension_numbers<[1], [0], [0], [1], [0, 0, 1, 1], [], []>} : vector<16x32xf32>, vector<32x64xf32>, vector<16x64xf32> -> vector<16x64xf32>
    %c0_50 = arith.constant 0 : index
    %c0_51 = arith.constant 0 : index
    %82 = vector.load %arg10[%c0_50, %c0_51] : memref<1x64xf32, #tpu.memory_space<vmem>>, vector<1x64xf32>
    %83 = vector.broadcast %82 : vector<1x64xf32> to vector<16x64xf32>
    %84 = arith.addf %81, %83 : vector<16x64xf32>
    %cst_52 = arith.constant 0.000000e+00 : f32
    %85 = vector.broadcast %cst_52 : f32 to vector<16x64xf32>
    %86 = arith.maximumf %84, %85 : vector<16x64xf32>
    %c0_53 = arith.constant 0 : index
    %c0_54 = arith.constant 0 : index
    %87 = vector.load %arg11[%c0_53, %c0_54] : memref<64x32xf32, #tpu.memory_space<vmem>>, vector<64x32xf32>
    %cst_55 = arith.constant dense<0.000000e+00> : vector<16x32xf32>
    %88 = tpu.matmul %86, %87, %cst_55 {dimension_numbers = #tpu.dot_dimension_numbers<[1], [0], [0], [1], [0, 0, 1, 1], [], []>} : vector<16x64xf32>, vector<64x32xf32>, vector<16x32xf32> -> vector<16x32xf32>
    %c0_56 = arith.constant 0 : index
    %c0_57 = arith.constant 0 : index
    %89 = vector.load %arg12[%c0_56, %c0_57] : memref<1x32xf32, #tpu.memory_space<vmem>>, vector<1x32xf32>
    %90 = vector.broadcast %89 : vector<1x32xf32> to vector<16x32xf32>
    %91 = arith.addf %88, %90 : vector<16x32xf32>
    %92 = arith.addf %79, %91 : vector<16x32xf32>
    %c0_58 = arith.constant 0 : index
    %c0_59 = arith.constant 0 : index
    %93 = vector.load %arg13[%c0_58, %c0_59] : memref<1x32xf32, #tpu.memory_space<vmem>>, vector<1x32xf32>
    %c0_60 = arith.constant 0 : index
    %c0_61 = arith.constant 0 : index
    %94 = vector.load %arg14[%c0_60, %c0_61] : memref<1x32xf32, #tpu.memory_space<vmem>>, vector<1x32xf32>
    %cst_62 = arith.constant dense<0.000000e+00> : vector<16xf32>
    %95 = vector.multi_reduction <add>, %92, %cst_62 [1] : vector<16x32xf32> to vector<16xf32>
    %96 = vector.shape_cast %95 : vector<16xf32> to vector<16x1xf32>
    %cst_63 = arith.constant 3.200000e+01 : f32
    %97 = vector.broadcast %cst_63 : f32 to vector<16x1xf32>
    %98 = arith.divf %96, %97 : vector<16x1xf32>
    %99 = vector.broadcast %98 : vector<16x1xf32> to vector<16x32xf32>
    %100 = arith.subf %92, %99 : vector<16x32xf32>
    %101 = arith.mulf %100, %100 : vector<16x32xf32>
    %cst_64 = arith.constant dense<0.000000e+00> : vector<16xf32>
    %102 = vector.multi_reduction <add>, %101, %cst_64 [1] : vector<16x32xf32> to vector<16xf32>
    %103 = vector.shape_cast %102 : vector<16xf32> to vector<16x1xf32>
    %cst_65 = arith.constant 3.200000e+01 : f32
    %104 = vector.broadcast %cst_65 : f32 to vector<16x1xf32>
    %105 = arith.divf %103, %104 : vector<16x1xf32>
    %cst_66 = arith.constant 9.99999997E-7 : f32
    %106 = vector.broadcast %cst_66 : f32 to vector<16x1xf32>
    %107 = arith.addf %105, %106 : vector<16x1xf32>
    %108 = math.rsqrt %107 : vector<16x1xf32>
    %109 = vector.broadcast %108 : vector<16x1xf32> to vector<16x32xf32>
    %110 = arith.mulf %100, %109 : vector<16x32xf32>
    %111 = vector.broadcast %93 : vector<1x32xf32> to vector<16x32xf32>
    %112 = arith.mulf %110, %111 : vector<16x32xf32>
    %113 = vector.broadcast %94 : vector<1x32xf32> to vector<16x32xf32>
    %114 = arith.addf %112, %113 : vector<16x32xf32>
    %115 = vector.shape_cast %114 : vector<16x32xf32> to vector<2x8x32xf32>
    %c0_67 = arith.constant 0 : index
    %c0_68 = arith.constant 0 : index
    %c0_69 = arith.constant 0 : index
    %116 = vector.load %arg15[%c0_67, %c0_68, %c0_69] : memref<2x8x32xf32, #tpu.memory_space<vmem>>, vector<2x8x32xf32>
    tpu.vector_store %arg15[%c0_67, %c0_68, %c0_69], %115 {strides = array<i32>} : memref<2x8x32xf32, #tpu.memory_space<vmem>>, vector<2x8x32xf32>,
    return
  }
  func.func @transform_0(%arg0: i32) -> (i32, i32, i32) {
    %c0_i32 = arith.constant 0 : i32
    %c0_i32_0 = arith.constant 0 : i32
    %c0_i32_1 = arith.constant 0 : i32
    return %arg0, %c0_i32, %c0_i32_0 : i32, i32, i32
  }
  func.func @transform_1(%arg0: i32) -> (i32, i32) {
    %c0_i32 = arith.constant 0 : i32
    %c0_i32_0 = arith.constant 0 : i32
    %c0_i32_1 = arith.constant 0 : i32
    return %c0_i32, %c0_i32_0 : i32, i32
  }
  func.func @transform_2(%arg0: i32) -> (i32, i32, i32) {
    %c0_i32 = arith.constant 0 : i32
    %c0_i32_0 = arith.constant 0 : i32
    %c0_i32_1 = arith.constant 0 : i32
    %c0_i32_2 = arith.constant 0 : i32
    return %c0_i32, %c0_i32_0, %c0_i32_1 : i32, i32, i32
  }
  func.func @transform_3(%arg0: i32) -> (i32, i32, i32) {
    %c0_i32 = arith.constant 0 : i32
    %c0_i32_0 = arith.constant 0 : i32
    %c0_i32_1 = arith.constant 0 : i32
    %c0_i32_2 = arith.constant 0 : i32
    return %c0_i32, %c0_i32_0, %c0_i32_1 : i32, i32, i32
  }
  func.func @transform_4(%arg0: i32) -> (i32, i32, i32) {
    %c0_i32 = arith.constant 0 : i32
    %c0_i32_0 = arith.constant 0 : i32
    %c0_i32_1 = arith.constant 0 : i32
    %c0_i32_2 = arith.constant 0 : i32
    return %c0_i32, %c0_i32_0, %c0_i32_1 : i32, i32, i32
  }
  func.func @transform_5(%arg0: i32) -> (i32, i32, i32) {
    %c0_i32 = arith.constant 0 : i32
    %c0_i32_0 = arith.constant 0 : i32
    %c0_i32_1 = arith.constant 0 : i32
    %c0_i32_2 = arith.constant 0 : i32
    return %c0_i32, %c0_i32_0, %c0_i32_1 : i32, i32, i32
  }
  func.func @transform_6(%arg0: i32) -> (i32, i32) {
    %c0_i32 = arith.constant 0 : i32
    %c0_i32_0 = arith.constant 0 : i32
    %c0_i32_1 = arith.constant 0 : i32
    return %c0_i32, %c0_i32_0 : i32, i32
  }
  func.func @transform_7(%arg0: i32) -> (i32, i32) {
    %c0_i32 = arith.constant 0 : i32
    %c0_i32_0 = arith.constant 0 : i32
    %c0_i32_1 = arith.constant 0 : i32
    return %c0_i32, %c0_i32_0 : i32, i32
  }
  func.func @transform_8(%arg0: i32) -> (i32, i32) {
    %c0_i32 = arith.constant 0 : i32
    %c0_i32_0 = arith.constant 0 : i32
    %c0_i32_1 = arith.constant 0 : i32
    return %c0_i32, %c0_i32_0 : i32, i32
  }
  func.func @transform_9(%arg0: i32) -> (i32, i32) {
    %c0_i32 = arith.constant 0 : i32
    %c0_i32_0 = arith.constant 0 : i32
    %c0_i32_1 = arith.constant 0 : i32
    return %c0_i32, %c0_i32_0 : i32, i32
  }
  func.func @transform_10(%arg0: i32) -> (i32, i32) {
    %c0_i32 = arith.constant 0 : i32
    %c0_i32_0 = arith.constant 0 : i32
    %c0_i32_1 = arith.constant 0 : i32
    return %c0_i32, %c0_i32_0 : i32, i32
  }
  func.func @transform_11(%arg0: i32) -> (i32, i32) {
    %c0_i32 = arith.constant 0 : i32
    %c0_i32_0 = arith.constant 0 : i32
    %c0_i32_1 = arith.constant 0 : i32
    return %c0_i32, %c0_i32_0 : i32, i32
  }
  func.func @transform_12(%arg0: i32) -> (i32, i32) {
    %c0_i32 = arith.constant 0 : i32
    %c0_i32_0 = arith.constant 0 : i32
    %c0_i32_1 = arith.constant 0 : i32
    return %c0_i32, %c0_i32_0 : i32, i32
  }
  func.func @transform_13(%arg0: i32) -> (i32, i32) {
    %c0_i32 = arith.constant 0 : i32
    %c0_i32_0 = arith.constant 0 : i32
    %c0_i32_1 = arith.constant 0 : i32
    return %c0_i32, %c0_i32_0 : i32, i32
  }
  func.func @transform_14(%arg0: i32) -> (i32, i32, i32) {
    %c0_i32 = arith.constant 0 : i32
    %c0_i32_0 = arith.constant 0 : i32
    %c0_i32_1 = arith.constant 0 : i32
    return %arg0, %c0_i32, %c0_i32_0 : i32, i32, i32
  }
}

</mosaic_0001>

<bundles_post_ra>
// kernel: tpu_custom_call.1
= control target key start
LH: loop header
LB: loop body
LE: loop exit
PB: predicated region body
PF: predicated region fallthrough
CT: control target
= control target key end

     0   :  { %v4877_v3 = vmov 0.0|0.0   ;;  %vm4878_vm0 = vmmov 0   ;;  %v4879_v11 = vmov 0.0   ;;  %vm102_vm1 = vcmask 261120   ;;  %s5628_s0 = inlined_call_operand.vmem [shape: f32[2,8,32], index: 0, kind: input, shape index: {}]   ;;  %s5629_s1 = inlined_call_operand.vmem [shape: f32[8,8], index: 1, kind: input, shape index: {}]   ;;  %s5630_s2 = inlined_call_operand.vmem [shape: f32[4,32,8], index: 2, kind: input, shape index: {}]   ;;  %s5631_s3 = inlined_call_operand.vmem [shape: f32[4,32,8], index: 3, kind: input, shape index: {}]   ;;  %s5632_s4 = inlined_call_operand.vmem [shape: f32[4,32,8], index: 4, kind: input, shape index: {}]   ;;  %s5633_s5 = inlined_call_operand.vmem [shape: f32[4,8,32], index: 5, kind: input, shape index: {}]   ;;  %s5634_s6 = inlined_call_operand.vmem [shape: f32[1,32], index: 6, kind: input, shape index: {}]   ;;  %s5635_s7 = inlined_call_operand.vmem [shape: f32[1,32], index: 7, kind: input, shape index: {}]   ;;  %s5636_s8 = inlined_call_operand.vmem [shape: f32[32,64], index: 8, kind: input, shape index: {}]   ;;  %s5637_s9 = inlined_call_operand.vmem [shape: f32[1,64], index: 9, kind: input, shape index: {}]   ;;  %s5638_s10 = inlined_call_operand.vmem [shape: f32[64,32], index: 10, kind: input, shape index: {}]   ;;  %s5639_s11 = inlined_call_operand.vmem [shape: f32[1,32], index: 11, kind: input, shape index: {}]   ;;  %s5640_s12 = inlined_call_operand.vmem [shape: f32[1,32], index: 12, kind: input, shape index: {}]   ;;  %s5641_s13 = inlined_call_operand.vmem [shape: f32[1,32], index: 13, kind: input, shape index: {}]   ;;  %s5642_s14 = inlined_call_operand.hbm [shape: f32[2,8,32], index: 14, kind: output, shape index: {}]  }
   0x1   :  { %v49_v0 = vld [vmem:[%s5630_s2] sm:$0xff]  ;;  %v50_v1 = vld [vmem:[%s5630_s2 + $0x8] sm:$0xff]  ;;  %4639 = vmatprep.subr.bf16.mxu0 %v4877_v3  ;;  %4645 = vmatprep.subr.bf16.mxu1 %v4877_v3  ;;  %v51_v6 = vld [vmem:[%s5630_s2 + $0x10] sm:$0xff] }
   0x2   :  { %v53_v2 = vld [vmem:[%s5630_s2 + $0x20] sm:$0xff]  ;;  %v4969_v4 = vpack.c.bf16 %v50_v1, %v49_v0  ;;  %v54_v5 = vld [vmem:[%s5630_s2 + $0x28] sm:$0xff]  ;;  %v52_v7 = vld [vmem:[%s5630_s2 + $0x18] sm:$0xff]  ;;  %4233 = vmatprep.mubr.msk.f32.mxu0 %vm4878_vm0, %v4879_v11  ;;  %4244 = vmatprep.mubr.msk.f32.mxu1 %vm4878_vm0, %v4879_v11 }
   0x3   :  { %v4980_v8 = vpack.c.bf16 %v54_v5, %v53_v2  ;;  %v55_v9 = vld [vmem:[%s5630_s2 + $0x30] sm:$0xff]  ;;  %v56_v10 = vld [vmem:[%s5630_s2 + $0x38] sm:$0xff]  ;;  %v4993_v12 = vpack.c.bf16 %v52_v7, %v51_v6  ;;  %v57_v14 = vld [vmem:[%s5630_s2 + $0x40] sm:$0xff] }
   0x4   :  { %4641 = vmatpush3.bf16.msra.mxu0 %v4969_v4  ;;  %v4997_v13 = vpack.c.bf16 %v56_v10, %v55_v9  ;;  %v58_v15 = vld [vmem:[%s5630_s2 + $0x48] sm:$0xff]  ;;  %v61_v16 = vld [vmem:[%s5630_s2 + $0x60] sm:$0xff]  ;;  %v59_v21 = vld [vmem:[%s5630_s2 + $0x50] sm:$0xff] }
   0x5   :  { %4647 = vmatpush3.bf16.msra.mxu1 %v4980_v8  ;;  %4642 = vmatprep.subr.bf16.mxu0 %v4877_v3  ;;  %v62_v17 = vld [vmem:[%s5630_s2 + $0x68] sm:$0xff]  ;;  %v5016_v18 = vld [vmem:[%s5628_s0] sm:$0xff]  ;;  %v5018_v19 = vpack.c.bf16 %v58_v15, %v57_v14  ;;  %v60_v22 = vld [vmem:[%s5630_s2 + $0x58] sm:$0xff] }
   0x6   :  { %4648 = vmatprep.subr.bf16.mxu1 %v4877_v3  ;;  %v5022_v20 = vpack.c.bf16 %v62_v17, %v61_v16  ;;  %v63_v23 = vld [vmem:[%s5630_s2 + $0x70] sm:$0xff]  ;;  %v64_v24 = vld [vmem:[%s5630_s2 + $0x78] sm:$0xff]  ;;  %v5042_v25 = vpack.c.bf16 %v60_v22, %v59_v21 }
   0x8   :  { %4644 = vmatpush3.bf16.msra.mxu0 %v4993_v12 }
   0x9   :  { %4650 = vmatpush3.bf16.msra.mxu1 %v4997_v13  ;;  %4651 = vmatprep.subr.bf16.mxu0 %v4877_v3 }
   0xa   :  { %4657 = vmatprep.subr.bf16.mxu1 %v4877_v3 }
   0xb   :  { %4234 = vmatmul.mubr.msk.f32.vlgmr.msra.gmra.mrb[0].mxu0 %vm102_vm1, %v5016_v18 }
   0xc   :  { %4245 = vmatmul.mubr.msk.f32.vlgmr.msra.gmra.mrb[0].mxu1 %vm102_vm1, %v5016_v18  ;;  %4653 = vmatpush3.bf16.msra.mxu0 %v5018_v19 }
   0xd   :  { %19 = vsyncpa [#allocation3], 0  ;;  %4659 = vmatpush3.bf16.msra.mxu1 %v5022_v20  ;;  %4654 = vmatprep.subr.bf16.mxu0 %v4877_v3  ;;  %v5046_v26 = vpack.c.bf16 %v64_v24, %v63_v23  ;;  %v65_v27 = vld [vmem:[%s5631_s3] sm:$0xff]  ;;  %v66_v28 = vld [vmem:[%s5631_s3 + $0x8] sm:$0xff]  ;;  %vm946_vm2 = vcmask 64512   ;;  %vm3828_vm3 = vcmask 523264  }
   0xe   :  { %4660 = vmatprep.subr.bf16.mxu1 %v4877_v3  ;;  %4255 = vmatprep.mubr.msk.f32.mxu0 %vm4878_vm0, %v4879_v11  ;;  %v69_v29 = vld [vmem:[%s5631_s3 + $0x20] sm:$0xff]  ;;  %v70_v30 = vld [vmem:[%s5631_s3 + $0x28] sm:$0xff]  ;;  %v5066_v31 = vpack.c.bf16 %v66_v28, %v65_v27  ;;  %v67_v33 = vld [vmem:[%s5631_s3 + $0x10] sm:$0xff]  ;;  %s4880_s21 = smov [#allocation2]  }
   0xf   :  { %4266 = vmatprep.mubr.msk.f32.mxu1 %vm4878_vm0, %v4879_v11  ;;  %v5070_v32 = vpack.c.bf16 %v70_v30, %v69_v29  ;;  %v68_v34 = vld [vmem:[%s5631_s3 + $0x18] sm:$0xff]  ;;  %v71_v35 = vld [vmem:[%s5631_s3 + $0x30] sm:$0xff]  ;;  %v73_v39 = vld [vmem:[%s5631_s3 + $0x40] sm:$0xff]  ;;  %s3963_s22 = sshll.u32 %s4880_s21, 4  ;;  %s3964_s22 = int_to_ptr.vmem [resolvable:$true] %s3963_s22 }
  0x10   :  { %4656 = vmatpush3.bf16.msra.mxu0 %v5042_v25  ;;  %v72_v36 = vld [vmem:[%s5631_s3 + $0x38] sm:$0xff]  ;;  %v5090_v37 = vpack.c.bf16 %v68_v34, %v67_v33  ;;  %v74_v40 = vld [vmem:[%s5631_s3 + $0x48] sm:$0xff]  ;;  %v77_v41 = vld [vmem:[%s5631_s3 + $0x60] sm:$0xff]  ;;  %s4853_s23 = scalar_lea.vmem %s3964_s22, 256  ;;  %p4858_p1 = scmp.lt.s32.totalorder %s3964_s22, %s3964_s22 }
  0x11   :  { %4662 = vmatpush3.bf16.msra.mxu1 %v5046_v26  ;;  %4663 = vmatprep.subr.bf16.mxu0 %v4877_v3  ;;  %v5094_v38 = vpack.c.bf16 %v72_v36, %v71_v35  ;;  %v78_v42 = vld [vmem:[%s5631_s3 + $0x68] sm:$0xff]  ;;  %v5114_v43 = vpack.c.bf16 %v74_v40, %v73_v39  ;;  %v75_v45 = vld [vmem:[%s5631_s3 + $0x50] sm:$0xff]  ;;  %v76_v46 = vld [vmem:[%s5631_s3 + $0x58] sm:$0xff]  ;;  %p4854_p0 = scmp.ne.s32.totalorder %s3964_s22, %s4853_s23  ;;  %p4859_p2 = scmp.lt.s32.totalorder %s4853_s23, %s4853_s23 }
  0x12   :  { %4669 = vmatprep.subr.bf16.mxu1 %v4877_v3  ;;  %v5118_v44 = vpack.c.bf16 %v78_v42, %v77_v41  ;;  %v79_v47 = vld [vmem:[%s5631_s3 + $0x70] sm:$0xff]  ;;  %v80_v48 = vld [vmem:[%s5631_s3 + $0x78] sm:$0xff]  ;;  %v5138_v49 = vpack.c.bf16 %v76_v46, %v75_v45  ;;  %v81_v51 = vld [vmem:[%s5632_s4] sm:$0xff] }
  0x13   :  { %4256 = vmatmul.mubr.msk.f32.vlgmr.msra.gmra.mrb[2].mxu0 %vm102_vm1, %v5016_v18  ;;  %v5142_v50 = vpack.c.bf16 %v80_v48, %v79_v47  ;;  %v82_v52 = vld [vmem:[%s5632_s4 + $0x8] sm:$0xff]  ;;  %v83_v54 = vld [vmem:[%s5632_s4 + $0x10] sm:$0xff]  ;;  %v84_v55 = vld [vmem:[%s5632_s4 + $0x18] sm:$0xff]  ;;  %p4860_p3 = por %p4859_p2, %p4858_p1 }
  0x14   :  { %4267 = vmatmul.mubr.msk.f32.vlgmr.msra.gmra.mrb[2].mxu1 %vm102_vm1, %v5016_v18  ;;  %4665 = vmatpush3.bf16.msra.mxu0 %v5066_v31  ;;  %v5156_v53 = vpack.c.bf16 %v82_v52, %v81_v51  ;;  %v5177_v56 = vpack.c.bf16 %v84_v55, %v83_v54  ;;  %v85_v57 = vld [vmem:[%s5632_s4 + $0x20] sm:$0xff]  ;;  %v86_v58 = vld [vmem:[%s5632_s4 + $0x28] sm:$0xff]  ;;  %v87_v63 = vld [vmem:[%s5632_s4 + $0x30] sm:$0xff] }
  0x15   :  { %4671 = vmatpush3.bf16.msra.mxu1 %v5070_v32  ;;  %4666 = vmatprep.subr.bf16.mxu0 %v4877_v3  ;;  %v89_v59 = vld [vmem:[%s5632_s4 + $0x40] sm:$0xff]  ;;  %v5190_v60 = vpack.c.bf16 %v86_v58, %v85_v57  ;;  %v90_v61 = vld [vmem:[%s5632_s4 + $0x48] sm:$0xff]  ;;  %v88_v0 = vld [vmem:[%s5632_s4 + $0x38] sm:$0xff]  ;;  %p4861_p4 = pnand %p4860_p3, %p4854_p0 }
  0x16   :  { %4672 = vmatprep.subr.bf16.mxu1 %v4877_v3  ;;  %4277 = vmatprep.mubr.msk.f32.mxu0 %vm4878_vm0, %v4879_v11  ;;  %v5195_v62 = vpack.c.bf16 %v90_v61, %v89_v59  ;;  %v91_v1 = vld [vmem:[%s5632_s4 + $0x50] sm:$0xff]  ;;  %v5214_v2 = vpack.c.bf16 %v88_v0, %v87_v63  ;;  %v92_v5 = vld [vmem:[%s5632_s4 + $0x58] sm:$0xff]  ;;  %v93_v7 = vld [vmem:[%s5632_s4 + $0x60] sm:$0xff] }
  0x17   :  { %4288 = vmatprep.mubr.msk.f32.mxu1 %vm4878_vm0, %v4879_v11  ;;  %v5219_v6 = vpack.c.bf16 %v92_v5, %v91_v1  ;;  %v94_v9 = vld [vmem:[%s5632_s4 + $0x68] sm:$0xff]  ;;  %v95_v14 = vld [vmem:[%s5632_s4 + $0x70] sm:$0xff]  ;;  %v96_v15 = vld [vmem:[%s5632_s4 + $0x78] sm:$0xff] }
  0x18   :  { %4668 = vmatpush3.bf16.msra.mxu0 %v5090_v37  ;;  %v5230_v10 = vpack.c.bf16 %v94_v9, %v93_v7  ;;  %v5247_v16 = vpack.c.bf16 %v96_v15, %v95_v14  ;;  %v5286_v55 = vld [vmem:[%s5629_s1] sm:$0xff] }
  0x19   :  { %4674 = vmatpush3.bf16.msra.mxu1 %v5094_v38  ;;  %4675 = vmatprep.subr.bf16.mxu0 %v4877_v3 }
  0x1a   :  { %4681 = vmatprep.subr.bf16.mxu1 %v4877_v3 }
  0x1b   :  { %4278 = vmatmul.mubr.msk.f32.vlgmr.msra.gmra.mrb[4].mxu0 %vm102_vm1, %v5016_v18 }
  0x1c   :  { %4289 = vmatmul.mubr.msk.f32.vlgmr.msra.gmra.mrb[4].mxu1 %vm102_vm1, %v5016_v18  ;;  %4677 = vmatpush3.bf16.msra.mxu0 %v5114_v43 }
  0x1d   :  { %4683 = vmatpush3.bf16.msra.mxu1 %v5118_v44  ;;  %4678 = vmatprep.subr.bf16.mxu0 %v4877_v3 }
  0x1e   :  { %4684 = vmatprep.subr.bf16.mxu1 %v4877_v3  ;;  %4299 = vmatprep.mubr.msk.f32.mxu0 %vm4878_vm0, %v4879_v11 }
  0x1f   :  { %4310 = vmatprep.mubr.msk.f32.mxu1 %vm4878_vm0, %v4879_v11 }
  0x20   :  { %4680 = vmatpush3.bf16.msra.mxu0 %v5138_v49 }
  0x21   :  { %4686 = vmatpush3.bf16.msra.mxu1 %v5142_v50  ;;  %4687 = vmatprep.subr.bf16.mxu0 %v4877_v3 }
  0x22   :  { %4693 = vmatprep.subr.bf16.mxu1 %v4877_v3 }
  0x23   :  { %4300 = vmatmul.mubr.msk.f32.vlgmr.msra.gmra.mrb[6].mxu0 %vm102_vm1, %v5016_v18 }
  0x24   :  { %4311 = vmatmul.mubr.msk.f32.vlgmr.msra.gmra.mrb[6].mxu1 %vm102_vm1, %v5016_v18  ;;  %4689 = vmatpush3.bf16.msra.mxu0 %v5156_v53 }
  0x25   :  { %4690 = vmatprep.subr.bf16.mxu0 %v4877_v3  ;;  %4321 = vmatprep.mubr.msk.f32.mxu0 %vm4878_vm0, %v4879_v11 }
  0x26   :  { %4332 = vmatprep.mubr.msk.f32.mxu1 %vm4878_vm0, %v4879_v11  ;;  %4695 = vmatpush3.bf16.msra.mxu1 %v5190_v60 }
  0x27   :  { %4696 = vmatprep.subr.bf16.mxu1 %v4877_v3 }
  0x28   :  { %4692 = vmatpush3.bf16.msra.mxu0 %v5177_v56 }
  0x29   :  { %4699 = vmatprep.subr.bf16.mxu0 %v4877_v3 }
  0x2a   :  { %4698 = vmatpush3.bf16.msra.mxu1 %v5214_v2 }
  0x2b   :  { %4322 = vmatmul.mubr.msk.f32.vlgmr.msra.gmra.mrb[8].mxu0 %vm102_vm1, %v5016_v18  ;;  %4705 = vmatprep.subr.bf16.mxu1 %v4877_v3 }
  0x2c   :  { %4701 = vmatpush3.bf16.msra.mxu0 %v5195_v62  ;;  %4343 = vmatprep.mubr.msk.f32.mxu0 %vm4878_vm0, %v4879_v11 }
  0x2d   :  { %4702 = vmatprep.subr.bf16.mxu0 %v4877_v3  ;;  %4333 = vmatmul.mubr.msk.f32.vlgmr.msra.gmra.mrb[8].mxu1 %vm102_vm1, %v5016_v18 }
  0x2e   :  { %4707 = vmatpush3.bf16.msra.mxu1 %v5230_v10  ;;  %4354 = vmatprep.mubr.msk.f32.mxu1 %vm4878_vm0, %v4879_v11 }
  0x2f   :  { %4708 = vmatprep.subr.bf16.mxu1 %v4877_v3 }
  0x30   :  { %4704 = vmatpush3.bf16.msra.mxu0 %v5219_v6 }
  0x31   :  { %4357 = vmatprep.subr.mxu0 %v4879_v11 }
  0x32   :  { %4710 = vmatpush3.bf16.msra.mxu1 %v5247_v16 }
  0x33   :  { %4344 = vmatmul.mubr.msk.f32.vlgmr.msra.gmra.mrb[10].mxu0 %vm102_vm1, %v5016_v18  ;;  %4372 = vmatprep.subr.mxu1 %v4879_v11 }
  0x34   :  { %4359 = vmatprep.mubr.msk.f32.mxu0 %vm4878_vm0, %v4879_v11 }
  0x35   :  { %4355 = vmatmul.mubr.msk.f32.vlgmr.msra.gmra.mrb[10].mxu1 %vm102_vm1, %v5016_v18 }
  0x36   :  { %4374 = vmatprep.mubr.msk.f32.mxu1 %vm4878_vm0, %v4879_v11 }
  0xde   :  { %v172_v17 = vpop.f32.mrb[0].mxu0 }
  0xdf   :  { %v4235_v21 = vpop.f32.mrb[1].mxu0  ;;  %v242_v22 = vpop.f32.mrb[0].mxu1 }
  0xe0   :  { %v4246_v23 = vpop.f32.mrb[1].mxu1 }
  0xe6   :  { %v312_v24 = vpop.f32.mrb[2].mxu0 }
  0xe7   :  { %v4257_v27 = vpop.f32.mrb[3].mxu0  ;;  %v382_v28 = vpop.f32.mrb[2].mxu1 }
  0xe8   :  { %v4268_v29 = vpop.f32.mrb[3].mxu1 }
  0xee   :  { %v452_v30 = vpop.f32.mrb[4].mxu0 }
  0xef   :  { %v4279_v33 = vpop.f32.mrb[5].mxu0  ;;  %4358 = vmatpush3.xpose.msk.msra.mxu0 %vm946_vm2, %v452_v30  ;;  %v522_v34 = vpop.f32.mrb[4].mxu1 }
  0xf0   :  { %v4290_v35 = vpop.f32.mrb[5].mxu1  ;;  %4362 = vmatprep.subr.mxu0 %v4879_v11 }
  0xf2   :  { %4360 = vmatmul.mubr.msk.f32.vlgmr.msra.gmra.mrb[12].mxu0 %vm946_vm2, %v172_v17 }
  0xf3   :  { %4363 = vmatpush3.xpose.msk.msra.mxu0 %vm946_vm2, %v522_v34  ;;  %4364 = vmatprep.mubr.msk.f32.mxu0 %vm4878_vm0, %v4879_v11 }
  0xf4   :  { %4367 = vmatprep.subr.mxu0 %v4879_v11 }
  0xf6   :  { %v592_v36 = vpop.f32.mrb[6].mxu0  ;;  %4365 = vmatmul.mubr.msk.f32.vlgmr.msra.gmra.mrb[14].mxu0 %vm946_vm2, %v242_v22 }
  0xf7   :  { %v662_v39 = vpop.f32.mrb[6].mxu1  ;;  %v4301_v40 = vpop.f32.mrb[7].mxu0  ;;  %4368 = vmatpush3.xpose.msk.msra.mxu0 %vm946_vm2, %v592_v36  ;;  %4369 = vmatprep.mubr.msk.f32.mxu0 %vm4878_vm0, %v4879_v11 }
  0xf8   :  { %4373 = vmatpush3.xpose.msk.msra.mxu1 %vm946_vm2, %v662_v39  ;;  %v4312_v41 = vpop.f32.mrb[7].mxu1  ;;  %4377 = vmatprep.subr.mxu0 %v4879_v11 }
  0xf9   :  { %4382 = vmatprep.subr.mxu1 %v4879_v11 }
  0xfa   :  { %4370 = vmatmul.mubr.msk.f32.vlgmr.msra.gmra.mrb[16].mxu0 %vm946_vm2, %v312_v24 }
  0xfb   :  { %4375 = vmatmul.mubr.msk.f32.vlgmr.msra.gmra.mrb[12].mxu1 %vm946_vm2, %v382_v28  ;;  %4379 = vmatprep.mubr.msk.f32.mxu0 %vm4878_vm0, %v4879_v11 }
  0xfc   :  { %4384 = vmatprep.mubr.msk.f32.mxu1 %vm4878_vm0, %v4879_v11 }
  0xfe   :  { %v732_v42 = vpop.f32.mrb[8].mxu0 }
  0xff   :  { %v4323_v45 = vpop.f32.mrb[9].mxu0  ;;  %4378 = vmatpush3.msra.mxu0 %v732_v42 }
 0x100   :  { %4387 = vmatprep.subr.mxu0 %v4879_v11  ;;  %v802_v46 = vpop.f32.mrb[8].mxu1 }
 0x101   :  { %v4334_v48 = vpop.f32.mrb[9].mxu1  ;;  %4383 = vmatpush3.msra.mxu1 %v802_v46 }
 0x102   :  { %4392 = vmatprep.subr.mxu1 %v4879_v11 }
 0x106   :  { %v5278_v47 = vpop.f32.mrb[10].mxu0 }
 0x107   :  { %v4345_v51 = vpop.f32.mrb[11].mxu0 }
 0x108   :  { %v5281_v52 = vpop.f32.mrb[10].mxu1 }
 0x109   :  { %v4356_v54 = vpop.f32.mrb[11].mxu1 }
 0x1c5   :  { %v1019_v57 = vpop.f32.mrb[12].mxu0 }
 0x1c6   :  { %v1020_v58 = vadd.f32 %v1019_v57, %v5286_v55  ;;  %v4361_v59 = vpop.f32.mrb[13].mxu0 }
 0x1c8   :  { %v1251_v61 = vsel %vm946_vm2, %v1020_v58, -inf }
 0x1c9   :  { %v1095_v63 = vpop.f32.mrb[14].mxu0  ;;  %1252 = vmax.xlane.f32.xlu0 %v1251_v61 }
 0x1ca   :  { %v1096_v0 = vadd.f32 %v1095_v63, %v5286_v55  ;;  %v4366_v1 = vpop.f32.mrb[15].mxu0 }
 0x1cc   :  { %v1254_v5 = vsel %vm946_vm2, %v1096_v0, -inf }
 0x1cd   :  { %v1171_v7 = vpop.f32.mrb[16].mxu0  ;;  %1255 = vmax.xlane.f32.xlu0 %v1254_v5 }
 0x1ce   :  { %v1172_v9 = vadd.f32 %v1171_v7, %v5286_v55  ;;  %v1247_v14 = vpop.f32.mrb[12].mxu1  ;;  %v4371_v15 = vpop.f32.mrb[17].mxu0 }
 0x1cf   :  { %v4376_v17 = vpop.f32.mrb[13].mxu1  ;;  %v1248_v21 = vadd.f32 %v1247_v14, %v5286_v55 }
 0x1d0   :  { %v1257_v22 = vsel %vm946_vm2, %v1172_v9, -inf }
 0x1d1   :  { %1258 = vmax.xlane.f32.xlu1 %v1257_v22  ;;  %v1260_v23 = vsel %vm946_vm2, %v1248_v21, -inf  ;;  %v5333_v22 = vld [vmem:[%s5633_s5 + $0x10] sm:$0xff] }
 0x1d5   :  { %1261 = vmax.xlane.f32.xlu1 %v1260_v23 }
 0x256   :  { %v1253_v24 = vpop.xlane.xlu0 %1252 }
 0x257   :  { %v1263_v27 = vsub.f32 %v1020_v58, %v1253_v24 }
 0x259   :  { %v1267_v28 = vmul.f32 1.442695, %v1263_v27  ;;  %v5343_v27 = vld [vmem:[%s5633_s5 + $0x18] sm:$0xff] }
 0x25a   :  { %v1256_v29 = vpop.xlane.xlu0 %1255 }
 0x25b   :  { %4813 = vpow2.f32 %v1267_v28  ;;  %v1264_v30 = vsub.f32 %v1096_v0, %v1256_v29 }
 0x25d   :  { %v1269_v33 = vmul.f32 1.442695, %v1264_v30 }
 0x25e   :  { %v1259_v34 = vpop.xlane.xlu1 %1258 }
 0x25f   :  { %4815 = vpow2.f32 %v1269_v33  ;;  %v1265_v35 = vsub.f32 %v1172_v9, %v1259_v34 }
 0x261   :  { %v1271_v36 = vmul.f32 1.442695, %v1265_v35 }
 0x262   :  { %v1262_v39 = vpop.xlane.xlu1 %1261 }
 0x263   :  { %4817 = vpow2.f32 %v1271_v36  ;;  %v1266_v40 = vsub.f32 %v1248_v21, %v1262_v39  ;;  %v5326_v21 = vld [vmem:[%s5633_s5 + $0x8] sm:$0xff] }
 0x264   :  { %v5361_v36 = vld [vmem:[%s5628_s0 + $0x8] sm:$0xff] }
 0x265   :  { %v4814_v41 = vpop.eup %4813  ;;  %v1273_v42 = vmul.f32 1.442695, %v1266_v40 }
 0x266   :  { %v1275_v45 = vsel %vm946_vm2, %v4814_v41, 0.0 }
 0x267   :  { %4819 = vpow2.f32 %v1273_v42  ;;  %1276 = vadd.xlane.f32.xlu0 %v1275_v45 }
 0x269   :  { %v4816_v46 = vpop.eup %4815 }
 0x26a   :  { %v1278_v48 = vsel %vm946_vm2, %v4816_v46, 0.0 }
 0x26b   :  { %1279 = vadd.xlane.f32.xlu1 %v1278_v48 }
 0x26d   :  { %v4818_v51 = vpop.eup %4817 }
 0x26e   :  { %v1281_v54 = vsel %vm946_vm2, %v4818_v51, 0.0 }
 0x26f   :  { %1282 = vadd.xlane.f32.xlu0 %v1281_v54 }
 0x271   :  { %v4820_v57 = vpop.eup %4819 }
 0x272   :  { %v1284_v58 = vsel %vm946_vm2, %v4820_v57, 0.0 }
 0x273   :  { %1285 = vadd.xlane.f32.xlu1 %v1284_v58 }
 0x2f4   :  { %v1277_v59 = vpop.xlane.xlu0 %1276 }
 0x2f5   :  { %4821 = vrcp.f32 %v1277_v59 }
 0x2f8   :  { %v1280_v61 = vpop.xlane.xlu1 %1279 }
 0x2f9   :  { %4823 = vrcp.f32 %v1280_v61 }
 0x2fc   :  { %v1283_v63 = vpop.xlane.xlu0 %1282 }
 0x2fd   :  { %4825 = vrcp.f32 %v1283_v63 }
 0x2ff   :  { %v4822_v0 = vpop.eup %4821 }
 0x300   :  { %v1291_v1 = vmul.f32 %v4822_v0, %v4814_v41  ;;  %v1286_v5 = vpop.xlane.xlu1 %1285 }
 0x301   :  { %4827 = vrcp.f32 %v1286_v5 }
 0x302   :  { %4380 = vmatmul.mubr.msk.f32.vlgmr.msra.gmra.mrb[18].mxu0 %vm946_vm2, %v1291_v1 }
 0x303   :  { %v4824_v7 = vpop.eup %4823  ;;  %4388 = vmatpush3.msra.mxu0 %v5278_v47  ;;  %4389 = vmatprep.mubr.msk.f32.mxu0 %vm4878_vm0, %v4879_v11 }
 0x304   :  { %v1292_v9 = vmul.f32 %v4824_v7, %v4816_v46  ;;  %4397 = vmatprep.subr.mxu0 %v4879_v11 }
 0x306   :  { %4385 = vmatmul.mubr.msk.f32.vlgmr.msra.gmra.mrb[14].mxu1 %vm946_vm2, %v1292_v9 }
 0x307   :  { %v4826_v14 = vpop.eup %4825  ;;  %4393 = vmatpush3.msra.mxu1 %v5281_v52  ;;  %4394 = vmatprep.mubr.msk.f32.mxu1 %vm4878_vm0, %v4879_v11  ;;  %v5319_v52 = vld [vmem:[%s5633_s5] sm:$0xff] }
 0x308   :  { %v1293_v15 = vmul.f32 %v4826_v14, %v4818_v51  ;;  %4402 = vmatprep.subr.mxu1 %v4879_v11 }
 0x30a   :  { %4390 = vmatmul.mubr.msk.f32.vlgmr.msra.gmra.mrb[20].mxu0 %vm946_vm2, %v1293_v15 }
 0x30b   :  { %v4828_v47 = vpop.eup %4827  ;;  %4399 = vmatprep.mubr.msk.f32.mxu0 %vm4878_vm0, %v4879_v11  ;;  %4398 = vmatpush3.msra.mxu0 %v5319_v52 }
 0x30c   :  { %v1294_v17 = vmul.f32 %v4828_v47, %v4820_v57  ;;  %4407 = vmatprep.subr.mxu0 %v4879_v11 }
 0x30e   :  { %4395 = vmatmul.mubr.msk.f32.vlgmr.msra.gmra.mrb[16].mxu1 %vm946_vm2, %v1294_v17 }
 0x30f   :  { %4404 = vmatprep.mubr.msk.f32.mxu1 %vm4878_vm0, %v4879_v11  ;;  %4403 = vmatpush3.msra.mxu1 %v5326_v21 }
 0x310   :  { %4412 = vmatprep.subr.mxu1 %v4879_v11 }
 0x3d5   :  { %v1364_v23 = vpop.f32.mrb[18].mxu0 }
 0x3d6   :  { %v4381_v24 = vpop.f32.mrb[19].mxu0  ;;  %4400 = vmatmul.mubr.msk.f32.vlgmr.msra.gmra.mrb[22].mxu0 %vm946_vm2, %v1364_v23 }
 0x3d7   :  { %4408 = vmatpush3.msra.mxu0 %v5333_v22  ;;  %4409 = vmatprep.mubr.msk.f32.mxu0 %vm4878_vm0, %v4879_v11 }
 0x3d8   :  { %4711 = vmatprep.subr.bf16.mxu0 %v4877_v3 }
 0x3d9   :  { %v1437_v28 = vpop.f32.mrb[14].mxu1 }
 0x3da   :  { %v4386_v29 = vpop.f32.mrb[15].mxu1  ;;  %4405 = vmatmul.mubr.msk.f32.vlgmr.msra.gmra.mrb[18].mxu1 %vm946_vm2, %v1437_v28 }
 0x3db   :  { %4413 = vmatpush3.msra.mxu1 %v5343_v27  ;;  %4414 = vmatprep.mubr.msk.f32.mxu1 %vm4878_vm0, %v4879_v11 }
 0x3dc   :  { %4717 = vmatprep.subr.bf16.mxu1 %v4877_v3 }
 0x3dd   :  { %v1510_v30 = vpop.f32.mrb[20].mxu0 }
 0x3de   :  { %v4391_v33 = vpop.f32.mrb[21].mxu0  ;;  %4410 = vmatmul.mubr.msk.f32.vlgmr.msra.gmra.mrb[24].mxu0 %vm946_vm2, %v1510_v30 }
 0x3df   :  { %4713 = vmatpush3.bf16.msra.mxu0 %v4969_v4  ;;  %4425 = vmatprep.mubr.msk.f32.mxu0 %vm4878_vm0, %v4879_v11 }
 0x3e0   :  { %4714 = vmatprep.subr.bf16.mxu0 %v4877_v3 }
 0x3e1   :  { %v1583_v34 = vpop.f32.mrb[16].mxu1 }
 0x3e2   :  { %v4396_v35 = vpop.f32.mrb[17].mxu1  ;;  %4415 = vmatmul.mubr.msk.f32.vlgmr.msra.gmra.mrb[20].mxu1 %vm946_vm2, %v1583_v34 }
 0x3e3   :  { %4716 = vmatpush3.bf16.msra.mxu0 %v4993_v12  ;;  %4719 = vmatpush3.bf16.msra.mxu1 %v4980_v8 }
 0x3e4   :  { %4720 = vmatprep.subr.bf16.mxu1 %v4877_v3  ;;  %4723 = vmatprep.subr.bf16.mxu0 %v4877_v3 }
 0x3e5   :  { %4436 = vmatprep.mubr.msk.f32.mxu1 %vm4878_vm0, %v4879_v11 }
 0x3e6   :  { %4426 = vmatmul.mubr.msk.f32.vlgmr.msra.gmra.mrb[26].mxu0 %vm102_vm1, %v5361_v36 }
 0x3e7   :  { %4722 = vmatpush3.bf16.msra.mxu1 %v4997_v13  ;;  %4725 = vmatpush3.bf16.msra.mxu0 %v5018_v19 }
 0x3e8   :  { %4726 = vmatprep.subr.bf16.mxu0 %v4877_v3  ;;  %4729 = vmatprep.subr.bf16.mxu1 %v4877_v3 }
 0x3e9   :  { %4447 = vmatprep.mubr.msk.f32.mxu0 %vm4878_vm0, %v4879_v11 }
 0x3ea   :  { %4437 = vmatmul.mubr.msk.f32.vlgmr.msra.gmra.mrb[22].mxu1 %vm102_vm1, %v5361_v36 }
 0x3eb   :  { %4728 = vmatpush3.bf16.msra.mxu0 %v5042_v25  ;;  %4731 = vmatpush3.bf16.msra.mxu1 %v5022_v20 }
 0x3ec   :  { %4732 = vmatprep.subr.bf16.mxu1 %v4877_v3  ;;  %4735 = vmatprep.subr.bf16.mxu0 %v4877_v3 }
 0x3ed   :  { %4458 = vmatprep.mubr.msk.f32.mxu1 %vm4878_vm0, %v4879_v11 }
 0x3ee   :  { %4448 = vmatmul.mubr.msk.f32.vlgmr.msra.gmra.mrb[28].mxu0 %vm102_vm1, %v5361_v36 }
 0x3ef   :  { %4734 = vmatpush3.bf16.msra.mxu1 %v5046_v26  ;;  %4737 = vmatpush3.bf16.msra.mxu0 %v5066_v31 }
 0x3f0   :  { %4738 = vmatprep.subr.bf16.mxu0 %v4877_v3  ;;  %4741 = vmatprep.subr.bf16.mxu1 %v4877_v3 }
 0x3f1   :  { %4469 = vmatprep.mubr.msk.f32.mxu0 %vm4878_vm0, %v4879_v11 }
 0x3f2   :  { %4459 = vmatmul.mubr.msk.f32.vlgmr.msra.gmra.mrb[24].mxu1 %vm102_vm1, %v5361_v36 }
 0x3f3   :  { %4740 = vmatpush3.bf16.msra.mxu0 %v5090_v37  ;;  %4743 = vmatpush3.bf16.msra.mxu1 %v5070_v32 }
 0x3f4   :  { %4744 = vmatprep.subr.bf16.mxu1 %v4877_v3  ;;  %4747 = vmatprep.subr.bf16.mxu0 %v4877_v3 }
 0x3f5   :  { %4480 = vmatprep.mubr.msk.f32.mxu1 %vm4878_vm0, %v4879_v11 }
 0x3f6   :  { %4470 = vmatmul.mubr.msk.f32.vlgmr.msra.gmra.mrb[30].mxu0 %vm102_vm1, %v5361_v36 }
 0x3f7   :  { %4746 = vmatpush3.bf16.msra.mxu1 %v5094_v38  ;;  %4749 = vmatpush3.bf16.msra.mxu0 %v5114_v43 }
 0x3f8   :  { %4750 = vmatprep.subr.bf16.mxu0 %v4877_v3  ;;  %4753 = vmatprep.subr.bf16.mxu1 %v4877_v3 }
 0x3f9   :  { %4491 = vmatprep.mubr.msk.f32.mxu0 %vm4878_vm0, %v4879_v11 }
 0x3fa   :  { %4481 = vmatmul.mubr.msk.f32.vlgmr.msra.gmra.mrb[26].mxu1 %vm102_vm1, %v5361_v36 }
 0x3fb   :  { %4752 = vmatpush3.bf16.msra.mxu0 %v5138_v49  ;;  %4755 = vmatpush3.bf16.msra.mxu1 %v5118_v44 }
 0x3fc   :  { %4756 = vmatprep.subr.bf16.mxu1 %v4877_v3  ;;  %4502 = vmatprep.mubr.msk.f32.mxu1 %vm4878_vm0, %v4879_v11 }
 0x3fd   :  { %4759 = vmatprep.subr.bf16.mxu0 %v4877_v3 }
 0x3fe   :  { %4492 = vmatmul.mubr.msk.f32.vlgmr.msra.gmra.mrb[32].mxu0 %vm102_vm1, %v5361_v36 }
 0x3ff   :  { %4758 = vmatpush3.bf16.msra.mxu1 %v5142_v50  ;;  %4761 = vmatpush3.bf16.msra.mxu0 %v5156_v53 }
 0x400   :  { %4762 = vmatprep.subr.bf16.mxu0 %v4877_v3  ;;  %4765 = vmatprep.subr.bf16.mxu1 %v4877_v3 }
 0x401   :  { %4513 = vmatprep.mubr.msk.f32.mxu0 %vm4878_vm0, %v4879_v11 }
 0x402   :  { %4503 = vmatmul.mubr.msk.f32.vlgmr.msra.gmra.mrb[28].mxu1 %vm102_vm1, %v5361_v36 }
 0x403   :  { %4764 = vmatpush3.bf16.msra.mxu0 %v5177_v56  ;;  %4767 = vmatpush3.bf16.msra.mxu1 %v5190_v60 }
 0x404   :  { %4768 = vmatprep.subr.bf16.mxu1 %v4877_v3  ;;  %4771 = vmatprep.subr.bf16.mxu0 %v4877_v3 }
 0x405   :  { %4524 = vmatprep.mubr.msk.f32.mxu1 %vm4878_vm0, %v4879_v11 }
 0x406   :  { %4514 = vmatmul.mubr.msk.f32.vlgmr.msra.gmra.mrb[34].mxu0 %vm102_vm1, %v5361_v36 }
 0x407   :  { %4770 = vmatpush3.bf16.msra.mxu1 %v5214_v2  ;;  %4773 = vmatpush3.bf16.msra.mxu0 %v5195_v62 }
 0x408   :  { %4774 = vmatprep.subr.bf16.mxu0 %v4877_v3  ;;  %4777 = vmatprep.subr.bf16.mxu1 %v4877_v3 }
 0x409   :  { %4535 = vmatprep.mubr.msk.f32.mxu0 %vm4878_vm0, %v4879_v11 }
 0x40a   :  { %4525 = vmatmul.mubr.msk.f32.vlgmr.msra.gmra.mrb[30].mxu1 %vm102_vm1, %v5361_v36 }
 0x40b   :  { %4776 = vmatpush3.bf16.msra.mxu0 %v5219_v6  ;;  %4779 = vmatpush3.bf16.msra.mxu1 %v5230_v10 }
 0x40c   :  { %4780 = vmatprep.subr.bf16.mxu1 %v4877_v3  ;;  %4549 = vmatprep.subr.mxu0 %v4879_v11 }
 0x40d   :  { %4546 = vmatprep.mubr.msk.f32.mxu1 %vm4878_vm0, %v4879_v11 }
 0x40e   :  { %4536 = vmatmul.mubr.msk.f32.vlgmr.msra.gmra.mrb[36].mxu0 %vm102_vm1, %v5361_v36 }
 0x40f   :  { %4782 = vmatpush3.bf16.msra.mxu1 %v5247_v16  ;;  %4551 = vmatprep.mubr.msk.f32.mxu0 %vm4878_vm0, %v4879_v11 }
 0x410   :  { %4554 = vmatprep.subr.mxu1 %v4879_v11 }
 0x412   :  { %4547 = vmatmul.mubr.msk.f32.vlgmr.msra.gmra.mrb[32].mxu1 %vm102_vm1, %v5361_v36 }
 0x413   :  { %4556 = vmatprep.mubr.msk.f32.mxu1 %vm4878_vm0, %v4879_v11 }
 0x4a9   :  { %v1656_v3 = vpop.f32.mrb[22].mxu0 }
 0x4aa   :  { %v4401_v4 = vpop.f32.mrb[23].mxu0  ;;  %v1879_v12 = vsel %vm102_vm1, %v1656_v3, 0.0 }
 0x4ad   :  { %v1729_v8 = vpop.f32.mrb[18].mxu1 }
 0x4ae   :  { %v1880_v13 = vsel %vm102_vm1, %v1729_v8, 0.0  ;;  %v4406_v19 = vpop.f32.mrb[19].mxu1 }
 0x4af   :  { %v1881_v20 = vadd.f32 %v1880_v13, %v1879_v12 }
 0x4b1   :  { %v1802_v25 = vpop.f32.mrb[24].mxu0 }
 0x4b2   :  { %v1882_v26 = vsel %vm102_vm1, %v1802_v25, 0.0  ;;  %v4411_v31 = vpop.f32.mrb[25].mxu0 }
 0x4b3   :  { %v1883_v32 = vadd.f32 %v1882_v26, %v1881_v20 }
 0x4b5   :  { %v1875_v37 = vpop.f32.mrb[20].mxu1 }
 0x4b6   :  { %v1884_v38 = vsel %vm102_vm1, %v1875_v37, 0.0  ;;  %v4416_v43 = vpop.f32.mrb[21].mxu1 }
 0x4b7   :  { %v5461_v44 = vadd.f32 %v1884_v38, %v1883_v32 }
 0x4b9   :  { %v1957_v49 = vpop.f32.mrb[26].mxu0 }
 0x4ba   :  { %v4427_v50 = vpop.f32.mrb[27].mxu0 }
 0x4bd   :  { %v2027_v53 = vpop.f32.mrb[22].mxu1 }
 0x4be   :  { %v4438_v56 = vpop.f32.mrb[23].mxu1 }
 0x4c1   :  { %v2097_v60 = vpop.f32.mrb[28].mxu0 }
 0x4c2   :  { %v4449_v62 = vpop.f32.mrb[29].mxu0 }
 0x4c5   :  { %v2167_v2 = vpop.f32.mrb[24].mxu1 }
 0x4c6   :  { %v4460_v6 = vpop.f32.mrb[25].mxu1 }
 0x4c9   :  { %v2237_v10 = vpop.f32.mrb[30].mxu0 }
 0x4ca   :  { %4550 = vmatpush3.xpose.msk.msra.mxu0 %vm946_vm2, %v2237_v10  ;;  %v4471_v16 = vpop.f32.mrb[31].mxu0 }
 0x4cb   :  { %4559 = vmatprep.subr.mxu0 %v4879_v11 }
 0x4cd   :  { %v2307_v39 = vpop.f32.mrb[26].mxu1  ;;  %4552 = vmatmul.mubr.msk.f32.vlgmr.msra.gmra.mrb[38].mxu0 %vm946_vm2, %v1957_v49 }
 0x4ce   :  { %v4482_v40 = vpop.f32.mrb[27].mxu1  ;;  %4555 = vmatpush3.xpose.msk.msra.mxu1 %vm946_vm2, %v2307_v39  ;;  %4561 = vmatprep.mubr.msk.f32.mxu0 %vm4878_vm0, %v4879_v11 }
 0x4cf   :  { %4564 = vmatprep.subr.mxu1 %v4879_v11 }
 0x4d1   :  { %v2377_v41 = vpop.f32.mrb[32].mxu0  ;;  %4557 = vmatmul.mubr.msk.f32.vlgmr.msra.gmra.mrb[34].mxu1 %vm946_vm2, %v2027_v53  ;;  %v3672_v53 = vadd.f32 %v5461_v44, %v5016_v18 }
 0x4d2   :  { %4560 = vmatpush3.xpose.msk.msra.mxu0 %vm946_vm2, %v2377_v41  ;;  %v4493_v42 = vpop.f32.mrb[33].mxu0  ;;  %4566 = vmatprep.mubr.msk.f32.mxu1 %vm4878_vm0, %v4879_v11 }
 0x4d3   :  { %4569 = vmatprep.subr.mxu0 %v4879_v11  ;;  %v3676_v62 = vsel %vm102_vm1, %v3672_v53, 0.0 }
 0x4d5   :  { %v2447_v45 = vpop.f32.mrb[28].mxu1  ;;  %4562 = vmatmul.mubr.msk.f32.vlgmr.msra.gmra.mrb[40].mxu0 %vm946_vm2, %v2097_v60 }
 0x4d6   :  { %v4504_v46 = vpop.f32.mrb[29].mxu1  ;;  %4565 = vmatpush3.xpose.msk.msra.mxu1 %vm946_vm2, %v2447_v45  ;;  %4571 = vmatprep.mubr.msk.f32.mxu0 %vm4878_vm0, %v4879_v11 }
 0x4d7   :  { %4574 = vmatprep.subr.mxu1 %v4879_v11 }
 0x4d9   :  { %4567 = vmatmul.mubr.msk.f32.vlgmr.msra.gmra.mrb[36].mxu1 %vm946_vm2, %v2167_v2  ;;  %v2517_v48 = vpop.f32.mrb[34].mxu0 }
 0x4da   :  { %v4515_v51 = vpop.f32.mrb[35].mxu0  ;;  %4570 = vmatpush3.msra.mxu0 %v2517_v48  ;;  %4576 = vmatprep.mubr.msk.f32.mxu1 %vm4878_vm0, %v4879_v11 }
 0x4db   :  { %4579 = vmatprep.subr.mxu0 %v4879_v11 }
 0x4dd   :  { %v2587_v54 = vpop.f32.mrb[30].mxu1 }
 0x4de   :  { %v4526_v57 = vpop.f32.mrb[31].mxu1  ;;  %4575 = vmatpush3.msra.mxu1 %v2587_v54 }
 0x4df   :  { %4584 = vmatprep.subr.mxu1 %v4879_v11 }
 0x4e1   :  { %v5485_v58 = vpop.f32.mrb[36].mxu0 }
 0x4e2   :  { %v4537_v59 = vpop.f32.mrb[37].mxu0 }
 0x4e5   :  { %v5487_v61 = vpop.f32.mrb[32].mxu1 }
 0x4e6   :  { %v4548_v63 = vpop.f32.mrb[33].mxu1 }
 0x5a0   :  { %v2803_v0 = vpop.f32.mrb[38].mxu0 }
 0x5a1   :  { %v2804_v1 = vadd.f32 %v2803_v0, %v5286_v55  ;;  %v4553_v5 = vpop.f32.mrb[39].mxu0 }
 0x5a3   :  { %v3035_v7 = vsel %vm946_vm2, %v2804_v1, -inf }
 0x5a4   :  { %v2879_v9 = vpop.f32.mrb[34].mxu1  ;;  %3036 = vmax.xlane.f32.xlu0 %v3035_v7  ;;  %v5529_v7 = vld [vmem:[%s5634_s6] ss:$0 sm:$0xff] }
 0x5a5   :  { %v2880_v14 = vadd.f32 %v2879_v9, %v5286_v55  ;;  %v4558_v15 = vpop.f32.mrb[35].mxu1 }
 0x5a6   :  { %v5539_v15 = vld [vmem:[%s5635_s7] ss:$0 sm:$0xff] }
 0x5a7   :  { %v3038_v47 = vsel %vm946_vm2, %v2880_v14, -inf }
 0x5a8   :  { %3039 = vmax.xlane.f32.xlu1 %v3038_v47  ;;  %v2955_v17 = vpop.f32.mrb[40].mxu0 }
 0x5a9   :  { %v2956_v23 = vadd.f32 %v2955_v17, %v5286_v55  ;;  %v4563_v24 = vpop.f32.mrb[41].mxu0 }
 0x5ab   :  { %v3041_v28 = vsel %vm946_vm2, %v2956_v23, -inf }
 0x5ac   :  { %v3031_v29 = vpop.f32.mrb[36].mxu1  ;;  %3042 = vmax.xlane.f32.xlu0 %v3041_v28 }
 0x5ad   :  { %v3032_v30 = vadd.f32 %v3031_v29, %v5286_v55  ;;  %v4568_v33 = vpop.f32.mrb[37].mxu1 }
 0x5af   :  { %v3044_v34 = vsel %vm946_vm2, %v3032_v30, -inf }
 0x5b0   :  { %3045 = vmax.xlane.f32.xlu1 %v3044_v34 }
 0x631   :  { %v3037_v35 = vpop.xlane.xlu0 %3036 }
 0x632   :  { %v3047_v3 = vsub.f32 %v2804_v1, %v3037_v35 }
 0x634   :  { %v3051_v4 = vmul.f32 1.442695, %v3047_v3 }
 0x635   :  { %v3040_v8 = vpop.xlane.xlu1 %3039 }
 0x636   :  { %4829 = vpow2.f32 %v3051_v4  ;;  %v3048_v12 = vsub.f32 %v2880_v14, %v3040_v8 }
 0x638   :  { %v3053_v13 = vmul.f32 1.442695, %v3048_v12 }
 0x639   :  { %v3043_v19 = vpop.xlane.xlu0 %3042 }
 0x63a   :  { %4831 = vpow2.f32 %v3053_v13  ;;  %v3049_v20 = vsub.f32 %v2956_v23, %v3043_v19 }
 0x63c   :  { %v3055_v25 = vmul.f32 1.442695, %v3049_v20 }
 0x63d   :  { %v3046_v26 = vpop.xlane.xlu1 %3045 }
 0x63e   :  { %4833 = vpow2.f32 %v3055_v25  ;;  %v3050_v31 = vsub.f32 %v3032_v30, %v3046_v26 }
 0x640   :  { %v4830_v32 = vpop.eup %4829  ;;  %v3057_v55 = vmul.f32 1.442695, %v3050_v31 }
 0x641   :  { %v3059_v37 = vsel %vm946_vm2, %v4830_v32, 0.0 }
 0x642   :  { %4835 = vpow2.f32 %v3057_v55  ;;  %3060 = vadd.xlane.f32.xlu0 %v3059_v37 }
 0x644   :  { %v4832_v38 = vpop.eup %4831 }
 0x645   :  { %v3062_v43 = vsel %vm946_vm2, %v4832_v38, 0.0 }
 0x646   :  { %3063 = vadd.xlane.f32.xlu1 %v3062_v43  ;;  %v3719_v43 = vld [vmem:[%s5636_s8] sm:$0xff] }
 0x648   :  { %v4834_v49 = vpop.eup %4833 }
 0x649   :  { %v3065_v50 = vsel %vm946_vm2, %v4834_v49, 0.0 }
 0x64a   :  { %3066 = vadd.xlane.f32.xlu0 %v3065_v50 }
 0x64c   :  { %v4836_v56 = vpop.eup %4835 }
 0x64d   :  { %v3068_v60 = vsel %vm946_vm2, %v4836_v56, 0.0 }
 0x64e   :  { %3069 = vadd.xlane.f32.xlu1 %v3068_v60  ;;  %3677 = vadd.xlane.f32.xlu0 %v3676_v62  ;;  %v3813_v60 = vld [vmem:[%s5638_s10] sm:$0xff]  ;;  %v3814_v62 = vld [vmem:[%s5638_s10 + $0x8] sm:$0xff] }
 0x6cf   :  { %v3061_v2 = vpop.xlane.xlu0 %3060 }
 0x6d0   :  { %4837 = vrcp.f32 %v3061_v2  ;;  %v3815_v2 = vld [vmem:[%s5638_s10 + $0x10] sm:$0xff] }
 0x6d3   :  { %v3064_v6 = vpop.xlane.xlu1 %3063 }
 0x6d4   :  { %4839 = vrcp.f32 %v3064_v6  ;;  %v4791_v6 = vpack.c.bf16 %v3814_v62, %v3813_v60 }
 0x6d7   :  { %v3067_v10 = vpop.xlane.xlu0 %3066 }
 0x6d8   :  { %4841 = vrcp.f32 %v3067_v10  ;;  %v3816_v10 = vld [vmem:[%s5638_s10 + $0x18] sm:$0xff] }
 0x6da   :  { %v4838_v16 = vpop.eup %4837 }
 0x6db   :  { %v3075_v39 = vmul.f32 %v4838_v16, %v4830_v32  ;;  %v3070_v40 = vpop.xlane.xlu1 %3069  ;;  %v3678_v41 = vpop.xlane.xlu0 %3677  ;;  %v4795_v16 = vpack.c.bf16 %v3816_v10, %v3815_v2 }
 0x6dc   :  { %4843 = vrcp.f32 %v3070_v40  ;;  %v3683_v18 = vmul.f32 0.03125, %v3678_v41  ;;  %v3818_v40 = vld [vmem:[%s5638_s10 + $0x28] sm:$0xff] }
 0x6dd   :  { %4572 = vmatmul.mubr.msk.f32.vlgmr.msra.gmra.mrb[42].mxu0 %vm946_vm2, %v3075_v39  ;;  %v3817_v39 = vld [vmem:[%s5638_s10 + $0x20] sm:$0xff] }
 0x6de   :  { %v4840_v44 = vpop.eup %4839  ;;  %v3685_v42 = vsub.f32 %v3672_v53, %v3683_v18  ;;  %4580 = vmatpush3.msra.mxu0 %v5485_v58  ;;  %4581 = vmatprep.mubr.msk.f32.mxu0 %vm4878_vm0, %v4879_v11  ;;  %v3722_v53 = vld [vmem:[%s5636_s8 + $0x18] sm:$0xff]  ;;  %v4799_v41 = vpack.c.bf16 %v3818_v40, %v3817_v39 }
 0x6df   :  { %v3076_v45 = vmul.f32 %v4840_v44, %v4832_v38  ;;  %4589 = vmatprep.subr.mxu0 %v4879_v11 }
 0x6e0   :  { %v3687_v46 = vmul.f32 %v3685_v42, %v3685_v42 }
 0x6e1   :  { %4577 = vmatmul.mubr.msk.f32.vlgmr.msra.gmra.mrb[38].mxu1 %vm946_vm2, %v3076_v45 }
 0x6e2   :  { %v4842_v48 = vpop.eup %4841  ;;  %4585 = vmatpush3.msra.mxu1 %v5487_v61  ;;  %v3689_v51 = vsel %vm102_vm1, %v3687_v46, 0.0  ;;  %4586 = vmatprep.mubr.msk.f32.mxu1 %vm4878_vm0, %v4879_v11 }
 0x6e3   :  { %v3077_v54 = vmul.f32 %v4842_v48, %v4834_v49  ;;  %3690 = vadd.xlane.f32.xlu0 %v3689_v51  ;;  %4594 = vmatprep.subr.mxu1 %v4879_v11  ;;  %v3720_v49 = vld [vmem:[%s5636_s8 + $0x8] sm:$0xff] }
 0x6e4   :  { %v4783_v50 = vpack.c.bf16 %v3720_v49, %v3719_v43 }
 0x6e5   :  { %4582 = vmatmul.mubr.msk.f32.vlgmr.msra.gmra.mrb[44].mxu0 %vm946_vm2, %v3077_v54  ;;  %v3819_v54 = vld [vmem:[%s5638_s10 + $0x30] sm:$0xff] }
 0x6e6   :  { %v4844_v57 = vpop.eup %4843  ;;  %4590 = vmatpush3.msra.mxu0 %v5319_v52  ;;  %4591 = vmatprep.mubr.msk.f32.mxu0 %vm4878_vm0, %v4879_v11 }
 0x6e7   :  { %v3078_v58 = vmul.f32 %v4844_v57, %v4836_v56  ;;  %4599 = vmatprep.subr.mxu0 %v4879_v11  ;;  %v3820_v57 = vld [vmem:[%s5638_s10 + $0x38] sm:$0xff] }
 0x6e9   :  { %4587 = vmatmul.mubr.msk.f32.vlgmr.msra.gmra.mrb[40].mxu1 %vm946_vm2, %v3078_v58  ;;  %v4803_v58 = vpack.c.bf16 %v3820_v57, %v3819_v54 }
 0x6ea   :  { %4595 = vmatpush3.msra.mxu1 %v5326_v21  ;;  %4596 = vmatprep.mubr.msk.f32.mxu1 %vm4878_vm0, %v4879_v11 }
 0x6eb   :  { %4604 = vmatprep.subr.mxu1 %v4879_v11 }
 0x770   :  { %v3691_v59 = vpop.xlane.xlu0 %3690 }
 0x771   :  { %v3695_v61 = vmul.f32 0.03125, %v3691_v59  ;;  %v4033_v59 = vld [vmem:[%s5637_s9] ss:$0 sm:$0xff] }
 0x773   :  { %v3697_v63 = vadd.f32 1e-06, %v3695_v61 }
 0x775   :  { %4845 = vrsqrt.f32 %v3697_v63 }
 0x77f   :  { %v4846_v52 = vpop.eup %4845 }
 0x780   :  { %v3701_v1 = vmul.f32 %v4846_v52, %v3685_v42 }
 0x782   :  { %v3709_v9 = vmul.f32 %v5529_v7, %v3701_v1 }
 0x784   :  { %v5545_v47 = vadd.f32 %v5539_v15, %v3709_v9 }
 0x7b0   :  { %v3148_v0 = vpop.f32.mrb[42].mxu0 }
 0x7b1   :  { %v4573_v5 = vpop.f32.mrb[43].mxu0  ;;  %4592 = vmatmul.mubr.msk.f32.vlgmr.msra.gmra.mrb[46].mxu0 %vm946_vm2, %v3148_v0 }
 0x7b2   :  { %4600 = vmatpush3.msra.mxu0 %v5333_v22  ;;  %4601 = vmatprep.mubr.msk.f32.mxu0 %vm4878_vm0, %v4879_v11 }
 0x7b3   :  { %4784 = vmatprep.subr.bf16.mxu0 %v4783_v50 }
 0x7b4   :  { %v3221_v21 = vpop.f32.mrb[38].mxu1 }
 0x7b5   :  { %v4578_v14 = vpop.f32.mrb[39].mxu1  ;;  %4597 = vmatmul.mubr.msk.f32.vlgmr.msra.gmra.mrb[42].mxu1 %vm946_vm2, %v3221_v21 }
 0x7b6   :  { %4605 = vmatpush3.msra.mxu1 %v5343_v27  ;;  %4606 = vmatprep.mubr.msk.f32.mxu1 %vm4878_vm0, %v4879_v11 }
 0x7b7   :  { %4792 = vmatprep.subr.bf16.mxu1 %v4791_v6 }
 0x7b8   :  { %v3294_v22 = vpop.f32.mrb[44].mxu0 }
 0x7b9   :  { %v4583_v17 = vpop.f32.mrb[45].mxu0  ;;  %4602 = vmatmul.mubr.msk.f32.vlgmr.msra.gmra.mrb[48].mxu0 %vm946_vm2, %v3294_v22 }
 0x7ba   :  { %4617 = vmatprep.mubr.msk.f32.mxu0 %vm102_vm1, %v5545_v47  ;;  %4786 = vmatpush3.bf16.msra.mxu0 %v4783_v50 }
 0x7bc   :  { %v3367_v23 = vpop.f32.mrb[40].mxu1 }
 0x7bd   :  { %v4588_v24 = vpop.f32.mrb[41].mxu1  ;;  %4607 = vmatmul.mubr.msk.f32.vlgmr.msra.gmra.mrb[44].mxu1 %vm946_vm2, %v3367_v23 }
 0x7be   :  { %4794 = vmatpush3.bf16.msra.mxu1 %v4791_v6 }
 0x7bf   :  { %4796 = vmatprep.subr.bf16.mxu1 %v4795_v16 }
 0x7c2   :  { %4798 = vmatpush3.bf16.msra.mxu1 %v4795_v16 }
 0x7c3   :  { %4800 = vmatprep.subr.bf16.mxu1 %v4799_v41 }
 0x7c6   :  { %4802 = vmatpush3.bf16.msra.mxu1 %v4799_v41 }
 0x7c7   :  { %4804 = vmatprep.subr.bf16.mxu1 %v4803_v58 }
 0x7ca   :  { %4806 = vmatpush3.bf16.msra.mxu1 %v4803_v58 }
 0x884   :  { %v3440_v28 = vpop.f32.mrb[46].mxu0 }
 0x885   :  { %v4593_v29 = vpop.f32.mrb[47].mxu0  ;;  %v3663_v30 = vsel %vm102_vm1, %v3440_v28, 0.0 }
 0x888   :  { %v3513_v27 = vpop.f32.mrb[42].mxu1 }
 0x889   :  { %v3664_v11 = vsel %vm102_vm1, %v3513_v27, 0.0  ;;  %v4598_v33 = vpop.f32.mrb[43].mxu1 }
 0x88a   :  { %v3665_v34 = vadd.f32 %v3664_v11, %v3663_v30 }
 0x88c   :  { %v3586_v35 = vpop.f32.mrb[48].mxu0 }
 0x88d   :  { %v3666_v3 = vsel %vm102_vm1, %v3586_v35, 0.0  ;;  %v4603_v4 = vpop.f32.mrb[49].mxu0 }
 0x88e   :  { %v3667_v8 = vadd.f32 %v3666_v3, %v3665_v34 }
 0x890   :  { %v3659_v12 = vpop.f32.mrb[44].mxu1 }
 0x891   :  { %v3668_v13 = vsel %vm102_vm1, %v3659_v12, 0.0  ;;  %v4608_v19 = vpop.f32.mrb[45].mxu1 }
 0x892   :  { %v3669_v20 = vadd.f32 %v3668_v13, %v3667_v8 }
 0x894   :  { %v3673_v25 = vadd.f32 %v5361_v36, %v3669_v20  ;;  %v3721_v36 = vld [vmem:[%s5636_s8 + $0x10] sm:$0xff] }
 0x895   :  { %v4787_v56 = vpack.c.bf16 %v3722_v53, %v3721_v36 }
 0x896   :  { %v3679_v26 = vsel %vm102_vm1, %v3673_v25, 0.0 }
 0x897   :  { %3680 = vadd.xlane.f32.xlu1 %v3679_v26  ;;  %4788 = vmatprep.subr.bf16.mxu0 %v4787_v56  ;;  %v4039_v26 = vld [vmem:[%s5640_s12] ss:$0 sm:$0xff] }
 0x898   :  { %4790 = vmatpush3.bf16.msra.mxu0 %v4787_v56 }
 0x924   :  { %v3681_v31 = vpop.xlane.xlu1 %3680 }
 0x925   :  { %v3684_v32 = vmul.f32 0.03125, %v3681_v31 }
 0x927   :  { %v3686_v55 = vsub.f32 %v3673_v25, %v3684_v32 }
 0x929   :  { %v3688_v37 = vmul.f32 %v3686_v55, %v3686_v55 }
 0x92b   :  { %v3692_v38 = vsel %vm102_vm1, %v3688_v37, 0.0  ;;  %v4040_v37 = vld [vmem:[%s5641_s13] ss:$0 sm:$0xff] }
 0x92c   :  { %3693 = vadd.xlane.f32.xlu1 %v3692_v38 }
 0x9b9   :  { %v3694_v18 = vpop.xlane.xlu1 %3693 }
 0x9ba   :  { %v3696_v44 = vmul.f32 0.03125, %v3694_v18 }
 0x9bc   :  { %v3698_v42 = vadd.f32 1e-06, %v3696_v44 }
 0x9be   :  { %4847 = vrsqrt.f32 %v3698_v42 }
 0x9c8   :  { %v4848_v45 = vpop.eup %4847 }
 0x9c9   :  { %v3702_v46 = vmul.f32 %v4848_v45, %v3686_v55 }
 0x9cb   :  { %v3710_v48 = vmul.f32 %v5529_v7, %v3702_v46  ;;  %v4036_v7 = vld [vmem:[%s5639_s11] ss:$0 sm:$0xff] }
 0x9cd   :  { %v3718_v51 = vadd.f32 %v5539_v15, %v3710_v48 }
 0x9cf   :  { %4618 = vmatmul.mubr.msk.f32.vlgmr.msra.gmra.mrb[50].mxu0 %vm102_vm1, %v3718_v51 }
 0xaa2   :  { %v4619_v61 = vpop.f32.mrb[50].mxu0 }
 0xaa3   :  { %v3808_v63 = vadd.f32 %v4619_v61, %v4033_v59  ;;  %v3802_v52 = vpop.f32.mrb[51].mxu0 }
 0xaa4   :  { %v3803_v0 = vadd.f32 %v4033_v59, %v3802_v52 }
 0xaa5   :  { %v3812_v5 = vmax.f32 %v3808_v63, 0.0 }
 0xaa6   :  { %v3811_v1 = vmax.f32 %v3803_v0, 0.0 }
 0xaa8   :  { %4636 = vmatprep.mubr.msk.f32.mxu1 %vm3828_vm3, %v3811_v1 }
 0xaa9   :  { %4637 = vmatmul.mubr.msk.f32.vlgmr.msra.gmra.mrb[46].mxu1 %vm3828_vm3, %v3812_v5 }
 0xb7c   :  { %v4638_v21 = vpop.f32.mrb[46].mxu1 }
 0xb7d   :  { %v3907_v9 = vadd.f32 %v4638_v21, %v4036_v7  ;;  %v3901_v14 = vpop.f32.mrb[47].mxu1 }
 0xb7e   :  { %v3902_v15 = vadd.f32 %v4036_v7, %v3901_v14 }
 0xb7f   :  { %v3911_v22 = vadd.f32 %v3907_v9, %v3718_v51 }
 0xb80   :  { %v3910_v17 = vadd.f32 %v3902_v15, %v5545_v47 }
 0xb81   :  { %v3917_v23 = vsel %vm102_vm1, %v3911_v22, 0.0 }
 0xb82   :  { %3918 = vadd.xlane.f32.xlu1 %v3917_v23  ;;  %v3914_v24 = vsel %vm102_vm1, %v3910_v17, 0.0 }
 0xb83   :  { %3915 = vadd.xlane.f32.xlu0 %v3914_v24 }
 0xc0f   :  { %v3919_v28 = vpop.xlane.xlu1 %3918 }
 0xc10   :  { %v3921_v29 = vmul.f32 0.03125, %v3919_v28  ;;  %v3916_v27 = vpop.xlane.xlu0 %3915 }
 0xc11   :  { %v3920_v30 = vmul.f32 0.03125, %v3916_v27 }
 0xc12   :  { %v3923_v11 = vsub.f32 %v3911_v22, %v3921_v29 }
 0xc13   :  { %v3922_v33 = vsub.f32 %v3910_v17, %v3920_v30 }
 0xc14   :  { %v3925_v34 = vmul.f32 %v3923_v11, %v3923_v11 }
 0xc15   :  { %v3924_v35 = vmul.f32 %v3922_v33, %v3922_v33 }
 0xc16   :  { %v3929_v3 = vsel %vm102_vm1, %v3925_v34, 0.0 }
 0xc17   :  { %3930 = vadd.xlane.f32.xlu1 %v3929_v3  ;;  %v3926_v4 = vsel %vm102_vm1, %v3924_v35, 0.0 }
 0xc18   :  { %3927 = vadd.xlane.f32.xlu0 %v3926_v4 }
 0xca4   :  { %v3931_v47 = vpop.xlane.xlu1 %3930 }
 0xca5   :  { %v3933_v8 = vmul.f32 0.03125, %v3931_v47  ;;  %v3928_v12 = vpop.xlane.xlu0 %3927 }
 0xca6   :  { %v3932_v13 = vmul.f32 0.03125, %v3928_v12 }
 0xca7   :  { %v3935_v19 = vadd.f32 1e-06, %v3933_v8 }
 0xca8   :  { %v3934_v20 = vadd.f32 1e-06, %v3932_v13 }
 0xca9   :  { %4849 = vrsqrt.f32 %v3935_v19 }
 0xcaa   :  { %4851 = vrsqrt.f32 %v3934_v20 }
 0xcb3   :  { %v4850_v25 = vpop.eup %4849 }
 0xcb4   :  { %v4852_v31 = vpop.eup %4851  ;;  %v3939_v32 = vmul.f32 %v4850_v25, %v3923_v11 }
 0xcb5   :  { %v3938_v55 = vmul.f32 %v4852_v31, %v3922_v33 }
 0xcb6   :  { %v3947_v38 = vmul.f32 %v4039_v26, %v3939_v32 }
 0xcb7   :  { %v3946_v43 = vmul.f32 %v4039_v26, %v3938_v55 }
 0xcb8   :  { %v3955_v49 = vadd.f32 %v4040_v37, %v3947_v38 }
 0xcb9   :  { %v3954_v50 = vadd.f32 %v4040_v37, %v3946_v43 }
 0xcba   :  { %3957 = vst.msk [vmem:[#allocation2 + $0x8] sm:$0xff] %vm102_vm1, %v3955_v49 }
 0xcbb   :  { %3956 = vst.msk [vmem:[#allocation2] sm:$0xff] %vm102_vm1, %v3954_v50 }
 0xcbc   :  { %4864 = shalt.err (!%p4861_p4)
}
 0xcbd   :  { %s4865_s24 = scalar_lea.hbm %s5642_s14, 256 }
 0xcbe   :  { %p4866_p5 = scmp.ne.s32.totalorder %s5642_s14, %s4865_s24  ;;  %p4869_p6 = scmp.lt.u32.totalorder %s4865_s24, %s5642_s14 }
 0xcc0   :  { %p4871_p7 = pnand %p4869_p6, %p4866_p5 }
 0xcc2   :  { %4874 = shalt.err (!%p4871_p7)
}
 0xcc3   :  { %s4881_s27 = smov 128   ;;  %s4882_s28 = smov 8  }
 0xcc4   :  { %3969 = dma.vmem_to_hbm [thread:$0]  %s3964_s22, 256, %s5642_s14, [#allocation3], %s4881_s27, %s4881_s27, %s4882_s28  }
 0xcc5   :  { %4875 = dma.done.wait [#allocation3], 256  }
 0xcc6   :  { %4876 = vsyncadd [#allocation3], 4294967040 }
 0xcc7   :  { %3973 = vsyncpa [#allocation3], 1 }

</bundles_post_ra>
